<compile_context>
chip_gen: v6e
topology: v6e:2x2x1
jax: 0.10.0
libtpu: 0.0.40
codegen_flags: <defaults>
</compile_context>

<pallas_src>
import functools

import jax
import jax.numpy as jnp
from jax.experimental import pallas as pl
from jax.experimental.pallas import tpu as pltpu


_INV_SQRT2 = 0.7071067811865476


# ----------------------------- in-kernel helpers -----------------------------

def _gelu(x):
    # exact (erf) GELU, matching torch.nn.GELU() default.
    # (v5e note: switch to tanh-GELU if VALU ever saturates; erf kept here for exact numerics.)
    return 0.5 * x * (1.0 + jax.lax.erf(x * jnp.float32(_INV_SQRT2)))


def _group_norm(h, gmask, gamma, beta, groups, eps=1e-5):
    """GroupNorm on a (C, HW) slab, one-pass stats.

    gmask[(C, C)] = 1 where channels share a group.  A single gmask matmul on
    [h | h*h] gives per-group sums of x and x^2 in one MXU round trip;
    var = E[x^2] - mean^2 (cancellation is negligible here in f32).
    """
    C, HW = h.shape
    inv_n = jnp.float32(1.0 / (HW * (C // groups)))
    hh = jnp.concatenate([h, h * h], axis=1)                              # (C, 2*HW)
    s = jnp.dot(gmask, hh, preferred_element_type=jnp.float32)            # (C, 2*HW)
    mean = jnp.sum(s[:, :HW], axis=1, keepdims=True) * inv_n              # (C, 1)
    ex2 = jnp.sum(s[:, HW:], axis=1, keepdims=True) * inv_n               # (C, 1)
    var = ex2 - mean * mean
    return (h - mean) * jax.lax.rsqrt(var + eps) * gamma + beta


def _build_patches(src, p_ref, shm_ref, W, HW):
    """Write the (9*C, HW) im2col patch slab of `src` (C, HW) into VMEM scratch p_ref.

    Tap (ky, kx) needs src at flat offset s = (ky-1)*W + (kx-1).  pltpu.roll follows
    np.roll semantics: roll(src, r, axis=1)[:, p] == src[:, (p - r) % HW], so r = (-s) % HW
    yields src[:, (p + s) % HW]; shm_ref[k] zeroes positions whose source pixel
    (y+ky-1, x+kx-1) falls outside the image.  One slab live at a time (no concat).
    """
    C = src.shape[0]
    for k in range(9):
        ky, kx = divmod(k, 3)
        s = (ky - 1) * W + (kx - 1)
        if s == 0:
            p_ref[k * C:(k + 1) * C, :] = src                 # centre tap: no shift, mask == 1
        else:
            shifted = pltpu.roll(src, (-s) % HW, axis=1)
            p_ref[k * C:(k + 1) * C, :] = shifted * shm_ref[k:k + 1, :]


# --------------------------------- kernel ------------------------------------

def resblock_kernel(x_ref, e_ref,
                    w1_ref, w2_ref, g1_ref, b1_ref, g2_ref, b2_ref,
                    rw_ref, rb_ref, gm1_ref, gm2_ref, shm_ref,
                    o_ref, p1_ref, p2_ref, *, groups, H, W):
    HW = H * W
    x = x_ref[0]                                              # (Cin, HW), lane-dense

    # ---- conv1: in-register im2col (roll+mask) -> single K=9*Cin MXU matmul ----
    _build_patches(x, p1_ref, shm_ref, W, HW)
    h = jnp.dot(w1_ref[...], p1_ref[...], preferred_element_type=jnp.float32)   # (Cmid, HW)
    h = _gelu(_group_norm(h, gm1_ref[...], g1_ref[...], b1_ref[...], groups))

    # ---- + timestep embedding (precomputed in the wrapper), broadcast over lanes ----
    h = h + e_ref[0]                                          # (Cmid, HW) + (Cmid, 1)

    # ---- conv2: same in-register im2col on h -> single K=9*Cmid matmul ----
    _build_patches(h, p2_ref, shm_ref, W, HW)
    h2 = jnp.dot(w2_ref[...], p2_ref[...], preferred_element_type=jnp.float32)  # (Cout, HW)
    h2 = _gelu(_group_norm(h2, gm2_ref[...], g2_ref[...], b2_ref[...], groups))

    # ---- 1x1 residual conv directly on x ----
    res = jnp.dot(rw_ref[...], x, preferred_element_type=jnp.float32) + rb_ref[...]

    o_ref[0] = h2 + res                                       # (Cout, HW): unmasked lane-dense store


# --------------------------------- wrapper ------------------------------------

def resblock_pallas(x, t, params, groups=8):
    """x: (B, Cin, H, W) NCHW; t: (B, pos).  Params use PyTorch layouts (OIHW / (out,in))."""
    B, Cin, H, W = x.shape
    Cmid = params['w1'].shape[0]
    Cout = params['w2'].shape[0]
    HW = H * W
    f32 = jnp.float32

    # --- batch-only timestep MLP (Linear -> SiLU -> Linear), hoisted out of the kernel ---
    e = t @ params['ew1'].T + params['eb1']
    e = e * jax.nn.sigmoid(e)
    e = (e @ params['ew2'].T + params['eb2'])[:, :, None]                 # (B, Cmid, 1)

    # --- x as a (B, Cin, HW) slab: channels on sublanes, flattened spatial on lanes ---
    xs = x.reshape(B, Cin, HW)

    # --- conv weights flattened to matmul form (Co, 9*Ci), tap order (ky, kx, ci) ---
    w1m = params['w1'].transpose(0, 2, 3, 1).reshape(Cmid, 9 * Cin)
    w2m = params['w2'].transpose(0, 2, 3, 1).reshape(Cout, 9 * Cmid)
    rw = params['rw'].reshape(Cout, Cin)
    rb = params['rb'].reshape(Cout, 1)
    g1 = params['g1'].reshape(Cmid, 1)
    b1 = params['b1'].reshape(Cmid, 1)
    g2 = params['g2'].reshape(Cout, 1)
    b2 = params['b2'].reshape(Cout, 1)

    # --- GroupNorm "same group" masks (C, C).  (Use (groups, C) summing mask at C >= 256.) ---
    def group_mask(C):
        gid = jnp.arange(C) // (C // groups)
        return (gid[:, None] == gid[None, :]).astype(f32)
    gm1, gm2 = group_mask(Cmid), group_mask(Cout)

    # --- 3x3 boundary-validity masks, one (1, HW) row per tap (shared by both convs) ---
    yy = jnp.arange(H)[:, None]
    xx = jnp.arange(W)[None, :]
    shm = jnp.stack(
        [((yy + ky - 1 >= 0) & (yy + ky - 1 < H) &
          (xx + kx - 1 >= 0) & (xx + kx - 1 < W)).reshape(HW)
         for ky in range(3) for kx in range(3)], axis=0).astype(f32)      # (9, HW)

    consts = [w1m, w2m, g1, b1, g2, b2, rw, rb, gm1, gm2, shm]
    kernel = functools.partial(resblock_kernel, groups=groups, H=H, W=W)

    # --- advisory cost estimate for XLA's scheduler ---
    flops = B * (2 * Cmid * 9 * Cin * HW            # conv1
                 + 2 * Cout * 9 * Cmid * HW         # conv2
                 + 2 * Cout * Cin * HW              # 1x1 residual
                 + 2 * Cmid * Cmid * 2 * HW         # GN1 group-sum matmul
                 + 2 * Cout * Cout * 2 * HW         # GN2 group-sum matmul
                 + 24 * (Cmid + Cout) * HW)         # elementwise (GN apply, GELU, adds)
    transcendentals = B * 2 * (Cmid + Cout) * HW    # erf + rsqrt-ish
    bytes_accessed = 4 * (xs.size + e.size + sum(int(c.size) for c in consts) + B * Cout * HW)
    cost = pl.CostEstimate(flops=int(flops), transcendentals=int(transcendentals),
                           bytes_accessed=int(bytes_accessed))

    out = pl.pallas_call(
        kernel,
        out_shape=jax.ShapeDtypeStruct((B, Cout, HW), f32),
        grid=(B,),
        in_specs=[
            pl.BlockSpec((1, Cin, HW), lambda b: (b, 0, 0)),              # x slab
            pl.BlockSpec((1, Cmid, 1), lambda b: (b, 0, 0)),              # time-emb output
        ] + [pl.BlockSpec(c.shape, lambda b: (0, 0)) for c in consts],    # small constants
        out_specs=pl.BlockSpec((1, Cout, HW), lambda b: (b, 0, 0)),
        scratch_shapes=[
            pltpu.VMEM((9 * Cin, HW), f32),                               # conv1 patch slab
            pltpu.VMEM((9 * Cmid, HW), f32),                              # conv2 patch slab
        ],
        compiler_params=pltpu.CompilerParams(
            dimension_semantics=("parallel",)),
        cost_estimate=cost,
    )(xs, e, *consts)

    # NCHW to match the PyTorch module; callers that accept (B, Cout, HW) should skip this
    # relayout entirely.
    return out.reshape(B, Cout, H, W)


# ----------------------------- pure-JAX reference ----------------------------

def resblock_ref(x, t, p, groups=8):
    conv = lambda inp, w: jax.lax.conv_general_dilated(
        inp, w, (1, 1), 'SAME', dimension_numbers=('NCHW', 'OIHW', 'NCHW'))

    def gn(h, gamma, beta):
        B, C, H, W = h.shape
        hg = h.reshape(B, groups, C // groups, H, W)
        mean = hg.mean(axis=(2, 3, 4), keepdims=True)
        var = hg.var(axis=(2, 3, 4), keepdims=True)
        hn = ((hg - mean) / jnp.sqrt(var + 1e-5)).reshape(B, C, H, W)
        return hn * gamma.reshape(1, C, 1, 1) + beta.reshape(1, C, 1, 1)

    gelu = lambda v: 0.5 * v * (1.0 + jax.lax.erf(v / jnp.sqrt(2.0)))
    h = gelu(gn(conv(x, p['w1']), p['g1'], p['b1']))
    e = t @ p['ew1'].T + p['eb1']
    e = e * jax.nn.sigmoid(e)
    e = e @ p['ew2'].T + p['eb2']
    h = h + e[:, :, None, None]
    h = gelu(gn(conv(h, p['w2']), p['g2'], p['b2']))
    res = conv(x, p['rw']) + p['rb'].reshape(1, -1, 1, 1)
    return h + res


# ----------------------------------- main -------------------------------------

if __name__ == "__main__":
    B, H, W = 2, 16, 16
    Cin, Cout, pos, G = 8, 16, 32, 8
    Cmid = Cout  # mid_channels defaults to out_channels

    key = jax.random.PRNGKey(0)
    ks = jax.random.split(key, 14)

    x = jax.random.normal(ks[0], (B, Cin, H, W), jnp.float32)   # NCHW, like PyTorch
    t = jax.random.normal(ks[1], (B, pos), jnp.float32)

    params = {
        'w1':  0.1 * jax.random.normal(ks[2], (Cmid, Cin, 3, 3), jnp.float32),
        'g1':  1.0 + 0.1 * jax.random.normal(ks[3], (Cmid,), jnp.float32),
        'b1':  0.1 * jax.random.normal(ks[4], (Cmid,), jnp.float32),
        'w2':  0.1 * jax.random.normal(ks[5], (Cout, Cmid, 3, 3), jnp.float32),
        'g2':  1.0 + 0.1 * jax.random.normal(ks[6], (Cout,), jnp.float32),
        'b2':  0.1 * jax.random.normal(ks[7], (Cout,), jnp.float32),
        'ew1': 0.1 * jax.random.normal(ks[8], (pos, pos), jnp.float32),
        'eb1': 0.1 * jax.random.normal(ks[9], (pos,), jnp.float32),
        'ew2': 0.1 * jax.random.normal(ks[10], (Cmid, pos), jnp.float32),
        'eb2': 0.1 * jax.random.normal(ks[11], (Cmid,), jnp.float32),
        'rw':  0.1 * jax.random.normal(ks[12], (Cout, Cin, 1, 1), jnp.float32),
        'rb':  0.1 * jax.random.normal(ks[13], (Cout,), jnp.float32),
    }

    run = jax.jit(resblock_pallas, static_argnames=("groups",))
    out = jax.block_until_ready(run(x, t, params, groups=G))
    ref = jax.block_until_ready(resblock_ref(x, t, params, groups=G))

    assert out.shape == (B, Cout, H, W)
    err = jnp.max(jnp.abs(out - ref))
    assert jnp.allclose(out, ref, rtol=1e-3, atol=1e-3), f"max abs err = {err}"

    print("KERNEL_OK")
</pallas_src>

<mosaic_0001>
module attributes {stable_mosaic.version = 11 : i64} {
  func.func @resblock_kernel(%arg0: i32, %arg1: memref<1x8x256xf32, #tpu.memory_space<vmem>>, %arg2: memref<1x16x1xf32, #tpu.memory_space<vmem>>, %arg3: memref<16x72xf32, #tpu.memory_space<vmem>>, %arg4: memref<16x144xf32, #tpu.memory_space<vmem>>, %arg5: memref<16x1xf32, #tpu.memory_space<vmem>>, %arg6: memref<16x1xf32, #tpu.memory_space<vmem>>, %arg7: memref<16x1xf32, #tpu.memory_space<vmem>>, %arg8: memref<16x1xf32, #tpu.memory_space<vmem>>, %arg9: memref<16x8xf32, #tpu.memory_space<vmem>>, %arg10: memref<16x1xf32, #tpu.memory_space<vmem>>, %arg11: memref<16x16xf32, #tpu.memory_space<vmem>>, %arg12: memref<16x16xf32, #tpu.memory_space<vmem>>, %arg13: memref<9x256xf32, #tpu.memory_space<vmem>>, %arg14: memref<1x16x256xf32, #tpu.memory_space<vmem>>, %arg15: memref<72x256xf32, #tpu.memory_space<vmem>>, %arg16: memref<144x256xf32, #tpu.memory_space<vmem>>) attributes {dimension_semantics = [#tpu.dimension_semantics<parallel>], iteration_bounds = array<i64: 2>, scalar_prefetch = 0 : i64, scratch_operands = 2 : i64, tpu.core_type = #tpu.core_type<tc>, window_params = [{transform_indices = @transform_0, window_bounds = array<i64: 1, 8, 256>}, {transform_indices = @transform_1, window_bounds = array<i64: 1, 16, 1>}, {pipeline_mode = #tpu.pipeline_mode<synchronous>, transform_indices = @transform_2, window_bounds = array<i64: 16, 72>}, {pipeline_mode = #tpu.pipeline_mode<synchronous>, transform_indices = @transform_3, window_bounds = array<i64: 16, 144>}, {pipeline_mode = #tpu.pipeline_mode<synchronous>, transform_indices = @transform_4, window_bounds = array<i64: 16, 1>}, {pipeline_mode = #tpu.pipeline_mode<synchronous>, transform_indices = @transform_5, window_bounds = array<i64: 16, 1>}, {pipeline_mode = #tpu.pipeline_mode<synchronous>, transform_indices = @transform_6, window_bounds = array<i64: 16, 1>}, {pipeline_mode = #tpu.pipeline_mode<synchronous>, transform_indices = @transform_7, window_bounds = array<i64: 16, 1>}, {pipeline_mode = #tpu.pipeline_mode<synchronous>, transform_indices = @transform_8, window_bounds = array<i64: 16, 8>}, {pipeline_mode = #tpu.pipeline_mode<synchronous>, transform_indices = @transform_9, window_bounds = array<i64: 16, 1>}, {pipeline_mode = #tpu.pipeline_mode<synchronous>, transform_indices = @transform_10, window_bounds = array<i64: 16, 16>}, {pipeline_mode = #tpu.pipeline_mode<synchronous>, transform_indices = @transform_11, window_bounds = array<i64: 16, 16>}, {pipeline_mode = #tpu.pipeline_mode<synchronous>, transform_indices = @transform_12, window_bounds = array<i64: 9, 256>}, {transform_indices = @transform_13, window_bounds = array<i64: 1, 16, 256>}]} {
    %c0 = arith.constant 0 : index
    %c0_0 = arith.constant 0 : index
    %c0_1 = arith.constant 0 : index
    %0 = vector.load %arg1[%c0, %c0_0, %c0_1] : memref<1x8x256xf32, #tpu.memory_space<vmem>>, vector<1x8x256xf32>
    %1 = vector.shape_cast %0 : vector<1x8x256xf32> to vector<8x256xf32>
    %c17_i32 = arith.constant 17 : i32
    %2 = tpu.dynamic_rotate %1 by %c17_i32 dim 1 : vector<8x256xf32>, i32 -> vector<8x256xf32>
    %c0_2 = arith.constant 0 : index
    %c0_3 = arith.constant 0 : index
    %3 = vector.load %arg13[%c0_2, %c0_3] : memref<9x256xf32, #tpu.memory_space<vmem>>, vector<1x256xf32>
    %4 = vector.broadcast %3 : vector<1x256xf32> to vector<8x256xf32>
    %5 = arith.mulf %2, %4 : vector<8x256xf32>
    %c0_4 = arith.constant 0 : index
    %c0_5 = arith.constant 0 : index
    %6 = vector.load %arg15[%c0_4, %c0_5] : memref<72x256xf32, #tpu.memory_space<vmem>>, vector<8x256xf32>
    tpu.vector_store %arg15[%c0_4, %c0_5], %5 {strides = array<i32>} : memref<72x256xf32, #tpu.memory_space<vmem>>, vector<8x256xf32>,
    %c16_i32 = arith.constant 16 : i32
    %7 = tpu.dynamic_rotate %1 by %c16_i32 dim 1 : vector<8x256xf32>, i32 -> vector<8x256xf32>
    %c1 = arith.constant 1 : index
    %c0_6 = arith.constant 0 : index
    %8 = vector.load %arg13[%c1, %c0_6] : memref<9x256xf32, #tpu.memory_space<vmem>>, vector<1x256xf32>
    %9 = vector.broadcast %8 : vector<1x256xf32> to vector<8x256xf32>
    %10 = arith.mulf %7, %9 : vector<8x256xf32>
    %c8 = arith.constant 8 : index
    %c0_7 = arith.constant 0 : index
    %11 = vector.load %arg15[%c8, %c0_7] : memref<72x256xf32, #tpu.memory_space<vmem>>, vector<8x256xf32>
    tpu.vector_store %arg15[%c8, %c0_7], %10 {strides = array<i32>} : memref<72x256xf32, #tpu.memory_space<vmem>>, vector<8x256xf32>,
    %c15_i32 = arith.constant 15 : i32
    %12 = tpu.dynamic_rotate %1 by %c15_i32 dim 1 : vector<8x256xf32>, i32 -> vector<8x256xf32>
    %c2 = arith.constant 2 : index
    %c0_8 = arith.constant 0 : index
    %13 = vector.load %arg13[%c2, %c0_8] : memref<9x256xf32, #tpu.memory_space<vmem>>, vector<1x256xf32>
    %14 = vector.broadcast %13 : vector<1x256xf32> to vector<8x256xf32>
    %15 = arith.mulf %12, %14 : vector<8x256xf32>
    %c16 = arith.constant 16 : index
    %c0_9 = arith.constant 0 : index
    %16 = vector.load %arg15[%c16, %c0_9] : memref<72x256xf32, #tpu.memory_space<vmem>>, vector<8x256xf32>
    tpu.vector_store %arg15[%c16, %c0_9], %15 {strides = array<i32>} : memref<72x256xf32, #tpu.memory_space<vmem>>, vector<8x256xf32>,
    %c1_i32 = arith.constant 1 : i32
    %17 = tpu.dynamic_rotate %1 by %c1_i32 dim 1 : vector<8x256xf32>, i32 -> vector<8x256xf32>
    %c3 = arith.constant 3 : index
    %c0_10 = arith.constant 0 : index
    %18 = vector.load %arg13[%c3, %c0_10] : memref<9x256xf32, #tpu.memory_space<vmem>>, vector<1x256xf32>
    %19 = vector.broadcast %18 : vector<1x256xf32> to vector<8x256xf32>
    %20 = arith.mulf %17, %19 : vector<8x256xf32>
    %c24 = arith.constant 24 : index
    %c0_11 = arith.constant 0 : index
    %21 = vector.load %arg15[%c24, %c0_11] : memref<72x256xf32, #tpu.memory_space<vmem>>, vector<8x256xf32>
    tpu.vector_store %arg15[%c24, %c0_11], %20 {strides = array<i32>} : memref<72x256xf32, #tpu.memory_space<vmem>>, vector<8x256xf32>,
    %c32 = arith.constant 32 : index
    %c0_12 = arith.constant 0 : index
    %22 = vector.load %arg15[%c32, %c0_12] : memref<72x256xf32, #tpu.memory_space<vmem>>, vector<8x256xf32>
    tpu.vector_store %arg15[%c32, %c0_12], %1 {strides = array<i32>} : memref<72x256xf32, #tpu.memory_space<vmem>>, vector<8x256xf32>,
    %c255_i32 = arith.constant 255 : i32
    %23 = tpu.dynamic_rotate %1 by %c255_i32 dim 1 : vector<8x256xf32>, i32 -> vector<8x256xf32>
    %c5 = arith.constant 5 : index
    %c0_13 = arith.constant 0 : index
    %24 = vector.load %arg13[%c5, %c0_13] : memref<9x256xf32, #tpu.memory_space<vmem>>, vector<1x256xf32>
    %25 = vector.broadcast %24 : vector<1x256xf32> to vector<8x256xf32>
    %26 = arith.mulf %23, %25 : vector<8x256xf32>
    %c40 = arith.constant 40 : index
    %c0_14 = arith.constant 0 : index
    %27 = vector.load %arg15[%c40, %c0_14] : memref<72x256xf32, #tpu.memory_space<vmem>>, vector<8x256xf32>
    tpu.vector_store %arg15[%c40, %c0_14], %26 {strides = array<i32>} : memref<72x256xf32, #tpu.memory_space<vmem>>, vector<8x256xf32>,
    %c241_i32 = arith.constant 241 : i32
    %28 = tpu.dynamic_rotate %1 by %c241_i32 dim 1 : vector<8x256xf32>, i32 -> vector<8x256xf32>
    %c6 = arith.constant 6 : index
    %c0_15 = arith.constant 0 : index
    %29 = vector.load %arg13[%c6, %c0_15] : memref<9x256xf32, #tpu.memory_space<vmem>>, vector<1x256xf32>
    %30 = vector.broadcast %29 : vector<1x256xf32> to vector<8x256xf32>
    %31 = arith.mulf %28, %30 : vector<8x256xf32>
    %c48 = arith.constant 48 : index
    %c0_16 = arith.constant 0 : index
    %32 = vector.load %arg15[%c48, %c0_16] : memref<72x256xf32, #tpu.memory_space<vmem>>, vector<8x256xf32>
    tpu.vector_store %arg15[%c48, %c0_16], %31 {strides = array<i32>} : memref<72x256xf32, #tpu.memory_space<vmem>>, vector<8x256xf32>,
    %c240_i32 = arith.constant 240 : i32
    %33 = tpu.dynamic_rotate %1 by %c240_i32 dim 1 : vector<8x256xf32>, i32 -> vector<8x256xf32>
    %c7 = arith.constant 7 : index
    %c0_17 = arith.constant 0 : index
    %34 = vector.load %arg13[%c7, %c0_17] : memref<9x256xf32, #tpu.memory_space<vmem>>, vector<1x256xf32>
    %35 = vector.broadcast %34 : vector<1x256xf32> to vector<8x256xf32>
    %36 = arith.mulf %33, %35 : vector<8x256xf32>
    %c56 = arith.constant 56 : index
    %c0_18 = arith.constant 0 : index
    %37 = vector.load %arg15[%c56, %c0_18] : memref<72x256xf32, #tpu.memory_space<vmem>>, vector<8x256xf32>
    tpu.vector_store %arg15[%c56, %c0_18], %36 {strides = array<i32>} : memref<72x256xf32, #tpu.memory_space<vmem>>, vector<8x256xf32>,
    %c239_i32 = arith.constant 239 : i32
    %38 = tpu.dynamic_rotate %1 by %c239_i32 dim 1 : vector<8x256xf32>, i32 -> vector<8x256xf32>
    %c8_19 = arith.constant 8 : index
    %c0_20 = arith.constant 0 : index
    %39 = vector.load %arg13[%c8_19, %c0_20] : memref<9x256xf32, #tpu.memory_space<vmem>>, vector<1x256xf32>
    %40 = vector.broadcast %39 : vector<1x256xf32> to vector<8x256xf32>
    %41 = arith.mulf %38, %40 : vector<8x256xf32>
    %c64 = arith.constant 64 : index
    %c0_21 = arith.constant 0 : index
    %42 = vector.load %arg15[%c64, %c0_21] : memref<72x256xf32, #tpu.memory_space<vmem>>, vector<8x256xf32>
    tpu.vector_store %arg15[%c64, %c0_21], %41 {strides = array<i32>} : memref<72x256xf32, #tpu.memory_space<vmem>>, vector<8x256xf32>,
    %c0_22 = arith.constant 0 : index
    %c0_23 = arith.constant 0 : index
    %43 = vector.load %arg3[%c0_22, %c0_23] : memref<16x72xf32, #tpu.memory_space<vmem>>, vector<16x72xf32>
    %c0_24 = arith.constant 0 : index
    %c0_25 = arith.constant 0 : index
    %44 = vector.load %arg15[%c0_24, %c0_25] : memref<72x256xf32, #tpu.memory_space<vmem>>, vector<72x256xf32>
    %cst = arith.constant dense<0.000000e+00> : vector<16x256xf32>
    %45 = tpu.matmul %43, %44, %cst {dimension_numbers = #tpu.dot_dimension_numbers<[1], [0], [0], [1], [0, 0, 1, 1], [], []>} : vector<16x72xf32>, vector<72x256xf32>, vector<16x256xf32> -> vector<16x256xf32>
    %c0_26 = arith.constant 0 : index
    %c0_27 = arith.constant 0 : index
    %46 = vector.load %arg11[%c0_26, %c0_27] : memref<16x16xf32, #tpu.memory_space<vmem>>, vector<16x16xf32>
    %c0_28 = arith.constant 0 : index
    %c0_29 = arith.constant 0 : index
    %47 = vector.load %arg5[%c0_28, %c0_29] : memref<16x1xf32, #tpu.memory_space<vmem>>, vector<16x1xf32>
    %c0_30 = arith.constant 0 : index
    %c0_31 = arith.constant 0 : index
    %48 = vector.load %arg6[%c0_30, %c0_31] : memref<16x1xf32, #tpu.memory_space<vmem>>, vector<16x1xf32>
    %49 = arith.mulf %45, %45 : vector<16x256xf32>
    %50 = tpu.concatenate %45, %49 in 1 : vector<16x256xf32>, vector<16x256xf32> -> vector<16x512xf32>
    %cst_32 = arith.constant dense<0.000000e+00> : vector<16x512xf32>
    %51 = tpu.matmul %46, %50, %cst_32 {dimension_numbers = #tpu.dot_dimension_numbers<[1], [0], [0], [1], [0, 0, 1, 1], [], []>} : vector<16x16xf32>, vector<16x512xf32>, vector<16x512xf32> -> vector<16x512xf32>
    %52 = vector.extract_strided_slice %51 {offsets = [0, 0], sizes = [16, 256], strides = [1, 1]} : vector<16x512xf32> to vector<16x256xf32>
    %cst_33 = arith.constant dense<0.000000e+00> : vector<16xf32>
    %53 = vector.multi_reduction <add>, %52, %cst_33 [1] : vector<16x256xf32> to vector<16xf32>
    %54 = vector.shape_cast %53 : vector<16xf32> to vector<16x1xf32>
    %cst_34 = arith.constant 0.001953125 : f32
    %55 = vector.broadcast %cst_34 : f32 to vector<16x1xf32>
    %56 = arith.mulf %54, %55 : vector<16x1xf32>
    %57 = vector.extract_strided_slice %51 {offsets = [0, 256], sizes = [16, 256], strides = [1, 1]} : vector<16x512xf32> to vector<16x256xf32>
    %cst_35 = arith.constant dense<0.000000e+00> : vector<16xf32>
    %58 = vector.multi_reduction <add>, %57, %cst_35 [1] : vector<16x256xf32> to vector<16xf32>
    %59 = vector.shape_cast %58 : vector<16xf32> to vector<16x1xf32>
    %cst_36 = arith.constant 0.001953125 : f32
    %60 = vector.broadcast %cst_36 : f32 to vector<16x1xf32>
    %61 = arith.mulf %59, %60 : vector<16x1xf32>
    %62 = arith.mulf %56, %56 : vector<16x1xf32>
    %63 = arith.subf %61, %62 : vector<16x1xf32>
    %64 = vector.broadcast %56 : vector<16x1xf32> to vector<16x256xf32>
    %65 = arith.subf %45, %64 : vector<16x256xf32>
    %cst_37 = arith.constant 9.99999974E-6 : f32
    %66 = vector.broadcast %cst_37 : f32 to vector<16x1xf32>
    %67 = arith.addf %63, %66 : vector<16x1xf32>
    %68 = math.rsqrt %67 : vector<16x1xf32>
    %69 = vector.broadcast %68 : vector<16x1xf32> to vector<16x256xf32>
    %70 = arith.mulf %65, %69 : vector<16x256xf32>
    %71 = vector.broadcast %47 : vector<16x1xf32> to vector<16x256xf32>
    %72 = arith.mulf %70, %71 : vector<16x256xf32>
    %73 = vector.broadcast %48 : vector<16x1xf32> to vector<16x256xf32>
    %74 = arith.addf %72, %73 : vector<16x256xf32>
    %cst_38 = arith.constant 5.000000e-01 : f32
    %75 = vector.broadcast %cst_38 : f32 to vector<16x256xf32>
    %76 = arith.mulf %75, %74 : vector<16x256xf32>
    %cst_39 = arith.constant 0.707106769 : f32
    %77 = vector.broadcast %cst_39 : f32 to vector<16x256xf32>
    %78 = arith.mulf %74, %77 : vector<16x256xf32>
    %79 = math.erf %78 : vector<16x256xf32>
    %cst_40 = arith.constant 1.000000e+00 : f32
    %80 = vector.broadcast %cst_40 : f32 to vector<16x256xf32>
    %81 = arith.addf %80, %79 : vector<16x256xf32>
    %82 = arith.mulf %76, %81 : vector<16x256xf32>
    %c0_41 = arith.constant 0 : index
    %c0_42 = arith.constant 0 : index
    %c0_43 = arith.constant 0 : index
    %83 = vector.load %arg2[%c0_41, %c0_42, %c0_43] : memref<1x16x1xf32, #tpu.memory_space<vmem>>, vector<1x16x1xf32>
    %84 = vector.shape_cast %83 : vector<1x16x1xf32> to vector<16x1xf32>
    %85 = vector.broadcast %84 : vector<16x1xf32> to vector<16x256xf32>
    %86 = arith.addf %82, %85 : vector<16x256xf32>
    %c17_i32_44 = arith.constant 17 : i32
    %87 = tpu.dynamic_rotate %86 by %c17_i32_44 dim 1 : vector<16x256xf32>, i32 -> vector<16x256xf32>
    %c0_45 = arith.constant 0 : index
    %c0_46 = arith.constant 0 : index
    %88 = vector.load %arg13[%c0_45, %c0_46] : memref<9x256xf32, #tpu.memory_space<vmem>>, vector<1x256xf32>
    %89 = vector.broadcast %88 : vector<1x256xf32> to vector<16x256xf32>
    %90 = arith.mulf %87, %89 : vector<16x256xf32>
    %c0_47 = arith.constant 0 : index
    %c0_48 = arith.constant 0 : index
    %91 = vector.load %arg16[%c0_47, %c0_48] : memref<144x256xf32, #tpu.memory_space<vmem>>, vector<16x256xf32>
    tpu.vector_store %arg16[%c0_47, %c0_48], %90 {strides = array<i32>} : memref<144x256xf32, #tpu.memory_space<vmem>>, vector<16x256xf32>,
    %c16_i32_49 = arith.constant 16 : i32
    %92 = tpu.dynamic_rotate %86 by %c16_i32_49 dim 1 : vector<16x256xf32>, i32 -> vector<16x256xf32>
    %c1_50 = arith.constant 1 : index
    %c0_51 = arith.constant 0 : index
    %93 = vector.load %arg13[%c1_50, %c0_51] : memref<9x256xf32, #tpu.memory_space<vmem>>, vector<1x256xf32>
    %94 = vector.broadcast %93 : vector<1x256xf32> to vector<16x256xf32>
    %95 = arith.mulf %92, %94 : vector<16x256xf32>
    %c16_52 = arith.constant 16 : index
    %c0_53 = arith.constant 0 : index
    %96 = vector.load %arg16[%c16_52, %c0_53] : memref<144x256xf32, #tpu.memory_space<vmem>>, vector<16x256xf32>
    tpu.vector_store %arg16[%c16_52, %c0_53], %95 {strides = array<i32>} : memref<144x256xf32, #tpu.memory_space<vmem>>, vector<16x256xf32>,
    %c15_i32_54 = arith.constant 15 : i32
    %97 = tpu.dynamic_rotate %86 by %c15_i32_54 dim 1 : vector<16x256xf32>, i32 -> vector<16x256xf32>
    %c2_55 = arith.constant 2 : index
    %c0_56 = arith.constant 0 : index
    %98 = vector.load %arg13[%c2_55, %c0_56] : memref<9x256xf32, #tpu.memory_space<vmem>>, vector<1x256xf32>
    %99 = vector.broadcast %98 : vector<1x256xf32> to vector<16x256xf32>
    %100 = arith.mulf %97, %99 : vector<16x256xf32>
    %c32_57 = arith.constant 32 : index
    %c0_58 = arith.constant 0 : index
    %101 = vector.load %arg16[%c32_57, %c0_58] : memref<144x256xf32, #tpu.memory_space<vmem>>, vector<16x256xf32>
    tpu.vector_store %arg16[%c32_57, %c0_58], %100 {strides = array<i32>} : memref<144x256xf32, #tpu.memory_space<vmem>>, vector<16x256xf32>,
    %c1_i32_59 = arith.constant 1 : i32
    %102 = tpu.dynamic_rotate %86 by %c1_i32_59 dim 1 : vector<16x256xf32>, i32 -> vector<16x256xf32>
    %c3_60 = arith.constant 3 : index
    %c0_61 = arith.constant 0 : index
    %103 = vector.load %arg13[%c3_60, %c0_61] : memref<9x256xf32, #tpu.memory_space<vmem>>, vector<1x256xf32>
    %104 = vector.broadcast %103 : vector<1x256xf32> to vector<16x256xf32>
    %105 = arith.mulf %102, %104 : vector<16x256xf32>
    %c48_62 = arith.constant 48 : index
    %c0_63 = arith.constant 0 : index
    %106 = vector.load %arg16[%c48_62, %c0_63] : memref<144x256xf32, #tpu.memory_space<vmem>>, vector<16x256xf32>
    tpu.vector_store %arg16[%c48_62, %c0_63], %105 {strides = array<i32>} : memref<144x256xf32, #tpu.memory_space<vmem>>, vector<16x256xf32>,
    %c64_64 = arith.constant 64 : index
    %c0_65 = arith.constant 0 : index
    %107 = vector.load %arg16[%c64_64, %c0_65] : memref<144x256xf32, #tpu.memory_space<vmem>>, vector<16x256xf32>
    tpu.vector_store %arg16[%c64_64, %c0_65], %86 {strides = array<i32>} : memref<144x256xf32, #tpu.memory_space<vmem>>, vector<16x256xf32>,
    %c255_i32_66 = arith.constant 255 : i32
    %108 = tpu.dynamic_rotate %86 by %c255_i32_66 dim 1 : vector<16x256xf32>, i32 -> vector<16x256xf32>
    %c5_67 = arith.constant 5 : index
    %c0_68 = arith.constant 0 : index
    %109 = vector.load %arg13[%c5_67, %c0_68] : memref<9x256xf32, #tpu.memory_space<vmem>>, vector<1x256xf32>
    %110 = vector.broadcast %109 : vector<1x256xf32> to vector<16x256xf32>
    %111 = arith.mulf %108, %110 : vector<16x256xf32>
    %c80 = arith.constant 80 : index
    %c0_69 = arith.constant 0 : index
    %112 = vector.load %arg16[%c80, %c0_69] : memref<144x256xf32, #tpu.memory_space<vmem>>, vector<16x256xf32>
    tpu.vector_store %arg16[%c80, %c0_69], %111 {strides = array<i32>} : memref<144x256xf32, #tpu.memory_space<vmem>>, vector<16x256xf32>,
    %c241_i32_70 = arith.constant 241 : i32
    %113 = tpu.dynamic_rotate %86 by %c241_i32_70 dim 1 : vector<16x256xf32>, i32 -> vector<16x256xf32>
    %c6_71 = arith.constant 6 : index
    %c0_72 = arith.constant 0 : index
    %114 = vector.load %arg13[%c6_71, %c0_72] : memref<9x256xf32, #tpu.memory_space<vmem>>, vector<1x256xf32>
    %115 = vector.broadcast %114 : vector<1x256xf32> to vector<16x256xf32>
    %116 = arith.mulf %113, %115 : vector<16x256xf32>
    %c96 = arith.constant 96 : index
    %c0_73 = arith.constant 0 : index
    %117 = vector.load %arg16[%c96, %c0_73] : memref<144x256xf32, #tpu.memory_space<vmem>>, vector<16x256xf32>
    tpu.vector_store %arg16[%c96, %c0_73], %116 {strides = array<i32>} : memref<144x256xf32, #tpu.memory_space<vmem>>, vector<16x256xf32>,
    %c240_i32_74 = arith.constant 240 : i32
    %118 = tpu.dynamic_rotate %86 by %c240_i32_74 dim 1 : vector<16x256xf32>, i32 -> vector<16x256xf32>
    %c7_75 = arith.constant 7 : index
    %c0_76 = arith.constant 0 : index
    %119 = vector.load %arg13[%c7_75, %c0_76] : memref<9x256xf32, #tpu.memory_space<vmem>>, vector<1x256xf32>
    %120 = vector.broadcast %119 : vector<1x256xf32> to vector<16x256xf32>
    %121 = arith.mulf %118, %120 : vector<16x256xf32>
    %c112 = arith.constant 112 : index
    %c0_77 = arith.constant 0 : index
    %122 = vector.load %arg16[%c112, %c0_77] : memref<144x256xf32, #tpu.memory_space<vmem>>, vector<16x256xf32>
    tpu.vector_store %arg16[%c112, %c0_77], %121 {strides = array<i32>} : memref<144x256xf32, #tpu.memory_space<vmem>>, vector<16x256xf32>,
    %c239_i32_78 = arith.constant 239 : i32
    %123 = tpu.dynamic_rotate %86 by %c239_i32_78 dim 1 : vector<16x256xf32>, i32 -> vector<16x256xf32>
    %c8_79 = arith.constant 8 : index
    %c0_80 = arith.constant 0 : index
    %124 = vector.load %arg13[%c8_79, %c0_80] : memref<9x256xf32, #tpu.memory_space<vmem>>, vector<1x256xf32>
    %125 = vector.broadcast %124 : vector<1x256xf32> to vector<16x256xf32>
    %126 = arith.mulf %123, %125 : vector<16x256xf32>
    %c128 = arith.constant 128 : index
    %c0_81 = arith.constant 0 : index
    %127 = vector.load %arg16[%c128, %c0_81] : memref<144x256xf32, #tpu.memory_space<vmem>>, vector<16x256xf32>
    tpu.vector_store %arg16[%c128, %c0_81], %126 {strides = array<i32>} : memref<144x256xf32, #tpu.memory_space<vmem>>, vector<16x256xf32>,
    %c0_82 = arith.constant 0 : index
    %c0_83 = arith.constant 0 : index
    %128 = vector.load %arg4[%c0_82, %c0_83] : memref<16x144xf32, #tpu.memory_space<vmem>>, vector<16x144xf32>
    %c0_84 = arith.constant 0 : index
    %c0_85 = arith.constant 0 : index
    %129 = vector.load %arg16[%c0_84, %c0_85] : memref<144x256xf32, #tpu.memory_space<vmem>>, vector<144x256xf32>
    %cst_86 = arith.constant dense<0.000000e+00> : vector<16x256xf32>
    %130 = tpu.matmul %128, %129, %cst_86 {dimension_numbers = #tpu.dot_dimension_numbers<[1], [0], [0], [1], [0, 0, 1, 1], [], []>} : vector<16x144xf32>, vector<144x256xf32>, vector<16x256xf32> -> vector<16x256xf32>
    %c0_87 = arith.constant 0 : index
    %c0_88 = arith.constant 0 : index
    %131 = vector.load %arg12[%c0_87, %c0_88] : memref<16x16xf32, #tpu.memory_space<vmem>>, vector<16x16xf32>
    %c0_89 = arith.constant 0 : index
    %c0_90 = arith.constant 0 : index
    %132 = vector.load %arg7[%c0_89, %c0_90] : memref<16x1xf32, #tpu.memory_space<vmem>>, vector<16x1xf32>
    %c0_91 = arith.constant 0 : index
    %c0_92 = arith.constant 0 : index
    %133 = vector.load %arg8[%c0_91, %c0_92] : memref<16x1xf32, #tpu.memory_space<vmem>>, vector<16x1xf32>
    %134 = arith.mulf %130, %130 : vector<16x256xf32>
    %135 = tpu.concatenate %130, %134 in 1 : vector<16x256xf32>, vector<16x256xf32> -> vector<16x512xf32>
    %cst_93 = arith.constant dense<0.000000e+00> : vector<16x512xf32>
    %136 = tpu.matmul %131, %135, %cst_93 {dimension_numbers = #tpu.dot_dimension_numbers<[1], [0], [0], [1], [0, 0, 1, 1], [], []>} : vector<16x16xf32>, vector<16x512xf32>, vector<16x512xf32> -> vector<16x512xf32>
    %137 = vector.extract_strided_slice %136 {offsets = [0, 0], sizes = [16, 256], strides = [1, 1]} : vector<16x512xf32> to vector<16x256xf32>
    %cst_94 = arith.constant dense<0.000000e+00> : vector<16xf32>
    %138 = vector.multi_reduction <add>, %137, %cst_94 [1] : vector<16x256xf32> to vector<16xf32>
    %139 = vector.shape_cast %138 : vector<16xf32> to vector<16x1xf32>
    %cst_95 = arith.constant 0.001953125 : f32
    %140 = vector.broadcast %cst_95 : f32 to vector<16x1xf32>
    %141 = arith.mulf %139, %140 : vector<16x1xf32>
    %142 = vector.extract_strided_slice %136 {offsets = [0, 256], sizes = [16, 256], strides = [1, 1]} : vector<16x512xf32> to vector<16x256xf32>
    %cst_96 = arith.constant dense<0.000000e+00> : vector<16xf32>
    %143 = vector.multi_reduction <add>, %142, %cst_96 [1] : vector<16x256xf32> to vector<16xf32>
    %144 = vector.shape_cast %143 : vector<16xf32> to vector<16x1xf32>
    %cst_97 = arith.constant 0.001953125 : f32
    %145 = vector.broadcast %cst_97 : f32 to vector<16x1xf32>
    %146 = arith.mulf %144, %145 : vector<16x1xf32>
    %147 = arith.mulf %141, %141 : vector<16x1xf32>
    %148 = arith.subf %146, %147 : vector<16x1xf32>
    %149 = vector.broadcast %141 : vector<16x1xf32> to vector<16x256xf32>
    %150 = arith.subf %130, %149 : vector<16x256xf32>
    %cst_98 = arith.constant 9.99999974E-6 : f32
    %151 = vector.broadcast %cst_98 : f32 to vector<16x1xf32>
    %152 = arith.addf %148, %151 : vector<16x1xf32>
    %153 = math.rsqrt %152 : vector<16x1xf32>
    %154 = vector.broadcast %153 : vector<16x1xf32> to vector<16x256xf32>
    %155 = arith.mulf %150, %154 : vector<16x256xf32>
    %156 = vector.broadcast %132 : vector<16x1xf32> to vector<16x256xf32>
    %157 = arith.mulf %155, %156 : vector<16x256xf32>
    %158 = vector.broadcast %133 : vector<16x1xf32> to vector<16x256xf32>
    %159 = arith.addf %157, %158 : vector<16x256xf32>
    %cst_99 = arith.constant 5.000000e-01 : f32
    %160 = vector.broadcast %cst_99 : f32 to vector<16x256xf32>
    %161 = arith.mulf %160, %159 : vector<16x256xf32>
    %cst_100 = arith.constant 0.707106769 : f32
    %162 = vector.broadcast %cst_100 : f32 to vector<16x256xf32>
    %163 = arith.mulf %159, %162 : vector<16x256xf32>
    %164 = math.erf %163 : vector<16x256xf32>
    %cst_101 = arith.constant 1.000000e+00 : f32
    %165 = vector.broadcast %cst_101 : f32 to vector<16x256xf32>
    %166 = arith.addf %165, %164 : vector<16x256xf32>
    %167 = arith.mulf %161, %166 : vector<16x256xf32>
    %c0_102 = arith.constant 0 : index
    %c0_103 = arith.constant 0 : index
    %168 = vector.load %arg9[%c0_102, %c0_103] : memref<16x8xf32, #tpu.memory_space<vmem>>, vector<16x8xf32>
    %cst_104 = arith.constant dense<0.000000e+00> : vector<16x256xf32>
    %169 = tpu.matmul %168, %1, %cst_104 {dimension_numbers = #tpu.dot_dimension_numbers<[1], [0], [0], [1], [0, 0, 1, 1], [], []>} : vector<16x8xf32>, vector<8x256xf32>, vector<16x256xf32> -> vector<16x256xf32>
    %c0_105 = arith.constant 0 : index
    %c0_106 = arith.constant 0 : index
    %170 = vector.load %arg10[%c0_105, %c0_106] : memref<16x1xf32, #tpu.memory_space<vmem>>, vector<16x1xf32>
    %171 = vector.broadcast %170 : vector<16x1xf32> to vector<16x256xf32>
    %172 = arith.addf %169, %171 : vector<16x256xf32>
    %173 = arith.addf %167, %172 : vector<16x256xf32>
    %c0_107 = arith.constant 0 : index
    %c0_108 = arith.constant 0 : index
    %c0_109 = arith.constant 0 : index
    %174 = vector.load %arg14[%c0_107, %c0_108, %c0_109] : memref<1x16x256xf32, #tpu.memory_space<vmem>>, vector<1x16x256xf32>
    %175 = vector.shape_cast %174 : vector<1x16x256xf32> to vector<16x256xf32>
    %176 = vector.shape_cast %173 : vector<16x256xf32> to vector<1x16x256xf32>
    tpu.vector_store %arg14[%c0_107, %c0_108, %c0_109], %176 {strides = array<i32>} : memref<1x16x256xf32, #tpu.memory_space<vmem>>, vector<1x16x256xf32>,
    return
  }
  func.func @transform_0(%arg0: i32) -> (i32, i32, i32) {
    %c0_i32 = arith.constant 0 : i32
    %c0_i32_0 = arith.constant 0 : i32
    %c0_i32_1 = arith.constant 0 : i32
    return %arg0, %c0_i32, %c0_i32_0 : i32, i32, i32
  }
  func.func @transform_1(%arg0: i32) -> (i32, i32, i32) {
    %c0_i32 = arith.constant 0 : i32
    %c0_i32_0 = arith.constant 0 : i32
    %c0_i32_1 = arith.constant 0 : i32
    return %arg0, %c0_i32, %c0_i32_0 : i32, i32, i32
  }
  func.func @transform_2(%arg0: i32) -> (i32, i32) {
    %c0_i32 = arith.constant 0 : i32
    %c0_i32_0 = arith.constant 0 : i32
    %c0_i32_1 = arith.constant 0 : i32
    return %c0_i32, %c0_i32_0 : i32, i32
  }
  func.func @transform_3(%arg0: i32) -> (i32, i32) {
    %c0_i32 = arith.constant 0 : i32
    %c0_i32_0 = arith.constant 0 : i32
    %c0_i32_1 = arith.constant 0 : i32
    return %c0_i32, %c0_i32_0 : i32, i32
  }
  func.func @transform_4(%arg0: i32) -> (i32, i32) {
    %c0_i32 = arith.constant 0 : i32
    %c0_i32_0 = arith.constant 0 : i32
    %c0_i32_1 = arith.constant 0 : i32
    return %c0_i32, %c0_i32_0 : i32, i32
  }
  func.func @transform_5(%arg0: i32) -> (i32, i32) {
    %c0_i32 = arith.constant 0 : i32
    %c0_i32_0 = arith.constant 0 : i32
    %c0_i32_1 = arith.constant 0 : i32
    return %c0_i32, %c0_i32_0 : i32, i32
  }
  func.func @transform_6(%arg0: i32) -> (i32, i32) {
    %c0_i32 = arith.constant 0 : i32
    %c0_i32_0 = arith.constant 0 : i32
    %c0_i32_1 = arith.constant 0 : i32
    return %c0_i32, %c0_i32_0 : i32, i32
  }
  func.func @transform_7(%arg0: i32) -> (i32, i32) {
    %c0_i32 = arith.constant 0 : i32
    %c0_i32_0 = arith.constant 0 : i32
    %c0_i32_1 = arith.constant 0 : i32
    return %c0_i32, %c0_i32_0 : i32, i32
  }
  func.func @transform_8(%arg0: i32) -> (i32, i32) {
    %c0_i32 = arith.constant 0 : i32
    %c0_i32_0 = arith.constant 0 : i32
    %c0_i32_1 = arith.constant 0 : i32
    return %c0_i32, %c0_i32_0 : i32, i32
  }
  func.func @transform_9(%arg0: i32) -> (i32, i32) {
    %c0_i32 = arith.constant 0 : i32
    %c0_i32_0 = arith.constant 0 : i32
    %c0_i32_1 = arith.constant 0 : i32
    return %c0_i32, %c0_i32_0 : i32, i32
  }
  func.func @transform_10(%arg0: i32) -> (i32, i32) {
    %c0_i32 = arith.constant 0 : i32
    %c0_i32_0 = arith.constant 0 : i32
    %c0_i32_1 = arith.constant 0 : i32
    return %c0_i32, %c0_i32_0 : i32, i32
  }
  func.func @transform_11(%arg0: i32) -> (i32, i32) {
    %c0_i32 = arith.constant 0 : i32
    %c0_i32_0 = arith.constant 0 : i32
    %c0_i32_1 = arith.constant 0 : i32
    return %c0_i32, %c0_i32_0 : i32, i32
  }
  func.func @transform_12(%arg0: i32) -> (i32, i32) {
    %c0_i32 = arith.constant 0 : i32
    %c0_i32_0 = arith.constant 0 : i32
    %c0_i32_1 = arith.constant 0 : i32
    return %c0_i32, %c0_i32_0 : i32, i32
  }
  func.func @transform_13(%arg0: i32) -> (i32, i32, i32) {
    %c0_i32 = arith.constant 0 : i32
    %c0_i32_0 = arith.constant 0 : i32
    %c0_i32_1 = arith.constant 0 : i32
    return %arg0, %c0_i32, %c0_i32_0 : i32, i32, i32
  }
}

</mosaic_0001>

<bundles_post_ra>
// kernel: resblock_pallas.1
= control target key start
LH: loop header
LB: loop body
LE: loop exit
PB: predicated region body
PF: predicated region fallthrough
CT: control target
= control target key end

     0   :  { %s2015_s25 = smov 0   ;;  %s2521_s0 = inlined_call_operand.vmem [shape: f32[2,8,256], index: 0, kind: input, shape index: {}]   ;;  %s2522_s1 = inlined_call_operand.vmem [shape: f32[2,16,1], index: 1, kind: input, shape index: {}]   ;;  %s2523_s2 = inlined_call_operand.vmem [shape: f32[16,72], index: 2, kind: input, shape index: {}]   ;;  %s2524_s3 = inlined_call_operand.vmem [shape: f32[16,144], index: 3, kind: input, shape index: {}]   ;;  %s2525_s4 = inlined_call_operand.vmem [shape: f32[16,1], index: 4, kind: input, shape index: {}]   ;;  %s2526_s5 = inlined_call_operand.vmem [shape: f32[16,1], index: 5, kind: input, shape index: {}]   ;;  %s2527_s6 = inlined_call_operand.vmem [shape: f32[16,1], index: 6, kind: input, shape index: {}]   ;;  %s2528_s7 = inlined_call_operand.vmem [shape: f32[16,1], index: 7, kind: input, shape index: {}]   ;;  %s2529_s8 = inlined_call_operand.vmem [shape: f32[16,8], index: 8, kind: input, shape index: {}]   ;;  %s2530_s9 = inlined_call_operand.vmem [shape: f32[16,1], index: 9, kind: input, shape index: {}]   ;;  %s2531_s10 = inlined_call_operand.vmem [shape: f32[16,16], index: 10, kind: input, shape index: {}, may-alias: {10,11}]   ;;  %s2532_s11 = inlined_call_operand.vmem [shape: f32[16,16], index: 11, kind: input, shape index: {}, may-alias: {10,11}]   ;;  %s2533_s12 = inlined_call_operand.vmem [shape: f32[9,256], index: 12, kind: input, shape index: {}]   ;;  %s2534_s13 = inlined_call_operand.vmem [shape: f32[2,16,256], index: 13, kind: output, shape index: {}]  }
   0x1 LB: > { %s1835_s26 = sadd.s32 4294967295, %s1933_s25   ;;  %p1839_p0 = scmp.ge.s32.totalorder %s1933_s25, 1  ;;  %s1933_s25 = sphi %s2015_s25, %s23_s25  }
   0x2   : > { %p397_p1 = scmp.lt.s32.totalorder %s1933_s25, 3 }
   0x4   : > { %p398_p2 = pnand %p1839_p0, %p397_p1 }
   0x5   : > { %p446_p3 = scmp.lt.s32.totalorder (!%p398_p2), %s1835_s26, 1  ;;  %s1935_s14 = smov (!%p398_p2), 112  }
   0x6   : > { %401 = sbr.rel (%p398_p2) target bundleno = 1542 (0x606), region = 72  ;;  %s2535_s15 = smov (!%p398_p2), 111  }
   0x7   : > { %s1937_s16 = smov (!%p398_p2), 113   ;;  %s1938_s17 = smov (!%p398_p2), 127  }
   0x8   : > { %s1939_s18 = smov (!%p398_p2), 1   ;;  %s1941_s19 = smov (!%p398_p2), 15  }
   0x9   : > { %s2539_s20 = smov (!%p398_p2), 16   ;;  %s2537_s21 = smov (!%p398_p2), 17  }
   0xb   : > { %s2545_s26 = smov (!%p446_p3, %s1835_s26), 1  ;;  %v1940_v2 = vmov 0.0   ;;  %v467_v3 = vlaneseq  ;;  %v1852_v8 = vld [vmem:[%s2533_s12 + $0x10] ss:$8 sm:$0x3]  ;;  %vm678_vm8 = vcmask 588800  }
   0xc   : > { %s1876_s27 = sshll.u32 %s2545_s26, 4  ;;  %749 = vmatprep.mubr.f32.mxu0 %v1940_v2  ;;  %849 = vmatprep.mubr.f32.mxu1 %v1940_v2  ;;  %v1851_v11 = vld [vmem:[%s2533_s12 + $0x7] ss:$8 sm:$0x3]  ;;  %vm772_vm9 = vcmask 130048   ;;  %vm1676_vm10 = vcmask 64512  }
   0xd   : > { %s450_s30 = scalar_lea.vmem %s2521_s0, %s1876_s27  ;;  %v475_v4 = vshrl.u32 %v467_v3, 7  ;;  %v2069_v5 = vand.u32 127, %v467_v3  ;;  %v1850_v13 = vld [vmem:[%s2533_s12 + $0x6] ss:$8 sm:$0x3] }
   0xe   : > { %v2031_v0 = vld [vmem:[%s450_s30] sm:$0xff]  ;;  %v2037_v1 = vld [vmem:[%s450_s30 + $0x8] sm:$0xff] }
   0xf   : > { %610 = vrot.lane.b32.xlu1 %v2031_v0, %s1935_s14  ;;  %634 = vrot.lane.b32.xlu0 %v2031_v0, %s2535_s15  ;;  %v2071_v6 = vsub.s32 0, %v475_v4  ;;  %v2073_v7 = vsub.s32 1, %v475_v4  ;;  %vm614_vm0 = vcmp.lt.s32.totalorder %v2069_v5, 112  ;;  %vm638_vm1 = vcmp.lt.s32.totalorder %v2069_v5, 111 }
  0x10   : > { %vm590_vm2 = vcmp.lt.s32.totalorder %v2069_v5, 113  ;;  %v1849_v27 = vld [vmem:[%s2533_s12 + $0x5] ss:$8 sm:$0x3]  ;;  %vm566_vm3 = vcmp.lt.s32.totalorder %v2069_v5, 127  ;;  %vm540_vm4 = vcmp.lt.s32.totalorder %v2069_v5, 1 }
  0x11   : > { %v651_v12 = vrot.slane %v1852_v8, %v2073_v7  ;;  %v647_v14 = vrot.slane %v1852_v8, %v2071_v6  ;;  %v623_v15 = vrot.slane %v1851_v11, %v2071_v6  ;;  %v627_v16 = vrot.slane %v1851_v11, %v2073_v7  ;;  %v1848_v38 = vld [vmem:[%s2533_s12 + $0x3] ss:$8 sm:$0x3]  ;;  %v1847_v47 = vld [vmem:[%s2533_s12 + $0x2] ss:$8 sm:$0x3] }
  0x12   : > { %v599_v22 = vrot.slane %v1850_v13, %v2071_v6  ;;  %v603_v25 = vrot.slane %v1850_v13, %v2073_v7  ;;  %v575_v36 = vrot.slane %v1849_v27, %v2071_v6  ;;  %v579_v37 = vrot.slane %v1849_v27, %v2073_v7  ;;  %v1846_v56 = vld [vmem:[%s2533_s12 + $0x1] ss:$8 sm:$0x3]  ;;  %v472_v4 = vld [vmem:[%s2533_s12] ss:$8 sm:$0x3] }
  0x13   : > { %612 = vrot.lane.b32.xlu1 %v2037_v1, %s1935_s14  ;;  %636 = vrot.lane.b32.xlu0 %v2037_v1, %s2535_s15  ;;  %v549_v45 = vrot.slane %v1848_v38, %v2071_v6  ;;  %v553_v46 = vrot.slane %v1848_v38, %v2073_v7  ;;  %vm516_vm5 = vcmp.lt.s32.totalorder %v2069_v5, 15  ;;  %v525_v54 = vrot.slane %v1847_v47, %v2071_v6  ;;  %s455_s15 = scalar_lea.vmem %s2522_s1, %s1876_s27  ;;  %s2541_s27 = smov 16  }
  0x14   : > { %v529_v55 = vrot.slane %v1847_v47, %v2073_v7  ;;  %vm492_vm6 = vcmp.lt.s32.totalorder %v2069_v5, 16  ;;  %v501_v63 = vrot.slane %v1846_v56, %v2071_v6  ;;  %v505_v3 = vrot.slane %v1846_v56, %v2073_v7 }
  0x15   : > { %vm469_vm7 = vcmp.lt.s32.totalorder %v2069_v5, 17  ;;  %v1291_v5 = vld [vmem:[%s2524_s3 + $0x10] sm:$0xff] }
  0x17   : > { %588 = vrot.lane.b32.xlu1 %v2037_v1, %s1937_s16  ;;  %586 = vrot.lane.b32.xlu0 %v2031_v0, %s1937_s16 }
  0x1b   : > { %564 = vrot.lane.b32.xlu1 %v2037_v1, %s1938_s17  ;;  %562 = vrot.lane.b32.xlu0 %v2031_v0, %s1938_s17 }
  0x1f   : > { %538 = vrot.lane.b32.xlu1 %v2037_v1, %s1939_s18  ;;  %536 = vrot.lane.b32.xlu0 %v2031_v0, %s1939_s18 }
  0x23   : > { %514 = vrot.lane.b32.xlu1 %v2037_v1, %s1941_s19  ;;  %512 = vrot.lane.b32.xlu0 %v2031_v0, %s1941_s19 }
  0x27   : > { %490 = vrot.lane.b32.xlu1 %v2037_v1, %s2539_s20  ;;  %488 = vrot.lane.b32.xlu0 %v2031_v0, %s2539_s20  ;;  %s2543_s20 = smov 111  }
  0x2b   : > { %465 = vrot.lane.b32.xlu1 %v2037_v1, %s2537_s21  ;;  %463 = vrot.lane.b32.xlu0 %v2031_v0, %s2537_s21 }
  0x81   : > { %v611_v9 = vpop.permute.xlu1 %610  ;;  %v635_v10 = vpop.permute.xlu0 %634 }
  0x85   : > { %v613_v17 = vpop.permute.xlu1 %612  ;;  %v637_v18 = vpop.permute.xlu0 %636 }
  0x86   : > { %v616_v19 = vsel %vm614_vm0, %v613_v17, %v611_v9  ;;  %v639_v20 = vsel %vm638_vm1, %v635_v10, %v637_v18  ;;  %v640_v21 = vsel %vm638_vm1, %v637_v18, %v635_v10  ;;  %v615_v23 = vsel %vm614_vm0, %v611_v9, %v613_v17 }
  0x87   : > { %v655_v24 = vmul.f32 %v651_v12, %v640_v21  ;;  %v654_v26 = vmul.f32 %v647_v14, %v639_v20  ;;  %v631_v28 = vmul.f32 %v627_v16, %v616_v19  ;;  %v630_v31 = vmul.f32 %v623_v15, %v615_v23  ;;  %v659_v23 = vld [vmem:[%s2523_s2 + $0x8] sm:$0xff] }
  0x88   : > { %v477_v14 = vrot.slane %v472_v4, %v2071_v6  ;;  %v481_v15 = vrot.slane %v472_v4, %v2073_v7 }
  0x89   : > { %v589_v29 = vpop.permute.xlu1 %588  ;;  %699 = vmatprep.subr.mxu0 %v655_v24  ;;  %v587_v30 = vpop.permute.xlu0 %586  ;;  %v765_v24 = vld [vmem:[%s2525_s4 + $0x8] sm:$0xff] }
  0x8a   : > { %v591_v32 = vsel %vm590_vm2, %v587_v30, %v589_v29  ;;  %v592_v33 = vsel %vm590_vm2, %v589_v29, %v587_v30  ;;  %700 = vmatpush1.msra.mxu0 %v654_v26  ;;  %v762_v30 = vld [vmem:[%s2531_s10] sm:$0xff] }
  0x8b   : > { %v606_v34 = vmul.f32 %v599_v22, %v591_v32  ;;  %v607_v35 = vmul.f32 %v603_v25, %v592_v33  ;;  %701 = vmatprep.subr.mxu0 %v631_v28  ;;  %v658_v22 = vld [vmem:[%s2523_s2] sm:$0xff]  ;;  %v1944_v25 = vmov 0  }
  0x8c   : > { %702 = vmatpush1.msra.mxu0 %v630_v31  ;;  %1901 = vset.pattern.permute.xlu1 %v1944_v25  ;;  %v763_v31 = vld [vmem:[%s2531_s10 + $0x8] sm:$0xff] }
  0x8d   : > { %v565_v39 = vpop.permute.xlu1 %564  ;;  %703 = vmatprep.subr.mxu0 %v607_v35  ;;  %v563_v40 = vpop.permute.xlu0 %562  ;;  %1902 = vset.pattern.permute.xlu0 %v1944_v25 }
  0x8e   : > { %v567_v41 = vsel %vm566_vm3, %v563_v40, %v565_v39  ;;  %v568_v42 = vsel %vm566_vm3, %v565_v39, %v563_v40  ;;  %704 = vmatpush1.msra.mxu0 %v606_v34  ;;  %972 = vperm.xlu1 %1901, %v765_v24  }
  0x8f   : > { %v582_v43 = vmul.f32 %v575_v36, %v567_v41  ;;  %v583_v44 = vmul.f32 %v579_v37, %v568_v42 }
  0x91   : > { %v539_v48 = vpop.permute.xlu1 %538  ;;  %705 = vmatprep.subr.mxu0 %v583_v44  ;;  %v537_v49 = vpop.permute.xlu0 %536 }
  0x92   : > { %v541_v50 = vsel %vm540_vm4, %v537_v49, %v539_v48  ;;  %v542_v51 = vsel %vm540_vm4, %v539_v48, %v537_v49  ;;  %706 = vmatpush1.msra.mxu0 %v582_v43  ;;  %v767_v48 = vld [vmem:[%s2526_s5 + $0x8] sm:$0xff]  ;;  %v766_v49 = vld [vmem:[%s2526_s5] sm:$0xff] }
  0x93   : > { %v556_v52 = vmul.f32 %v549_v45, %v542_v51  ;;  %v557_v53 = vmul.f32 %v553_v46, %v541_v50  ;;  %707 = vmatprep.subr.mxu0 %v2037_v1  ;;  %v1014_v50 = vld [vmem:[%s455_s15 + $0x8] sm:$0xff]  ;;  %v1013_v51 = vld [vmem:[%s455_s15] sm:$0xff]  ;;  %s2542_s15 = smov 17  }
  0x94   : > { %708 = vmatpush1.msra.mxu0 %v2031_v0 }
  0x95   : > { %v515_v57 = vpop.permute.xlu1 %514  ;;  %709 = vmatprep.subr.mxu0 %v557_v53  ;;  %v513_v58 = vpop.permute.xlu0 %512 }
  0x96   : > { %v517_v59 = vsel %vm516_vm5, %v513_v58, %v515_v57  ;;  %v518_v60 = vsel %vm516_vm5, %v515_v57, %v513_v58  ;;  %710 = vmatpush1.msra.mxu0 %v556_v52  ;;  %v764_v52 = vld [vmem:[%s2525_s4] sm:$0xff] }
  0x97   : > { %v532_v61 = vmul.f32 %v525_v54, %v518_v60  ;;  %v533_v62 = vmul.f32 %v529_v55, %v517_v59 }
  0x99   : > { %v491_v8 = vpop.permute.xlu1 %490  ;;  %711 = vmatprep.subr.mxu0 %v533_v62  ;;  %v489_v9 = vpop.permute.xlu0 %488 }
  0x9a   : > { %v493_v10 = vsel %vm492_vm6, %v489_v9, %v491_v8  ;;  %v494_v11 = vsel %vm492_vm6, %v491_v8, %v489_v9  ;;  %712 = vmatpush1.msra.mxu0 %v532_v61 }
  0x9b   : > { %v508_v12 = vmul.f32 %v501_v63, %v494_v11  ;;  %v509_v13 = vmul.f32 %v505_v3, %v493_v10 }
  0x9d   : > { %v466_v16 = vpop.permute.xlu1 %465  ;;  %713 = vmatprep.subr.mxu0 %v509_v13  ;;  %v464_v17 = vpop.permute.xlu0 %463 }
  0x9e   : > { %v470_v18 = vsel %vm469_vm7, %v464_v17, %v466_v16  ;;  %v471_v19 = vsel %vm469_vm7, %v466_v16, %v464_v17  ;;  %714 = vmatpush1.msra.mxu0 %v508_v12 }
  0x9f   : > { %v484_v20 = vmul.f32 %v477_v14, %v471_v19  ;;  %v485_v21 = vmul.f32 %v481_v15, %v470_v18 }
  0xa1   : > { %715 = vmatprep.subr.mxu0 %v485_v21 }
  0xa2   : > { %716 = vmatpush1.msra.mxu0 %v484_v20 }
  0xa3   : > { %1853 = vmatmul.mubr.msk.f32.vlgmr.msra.gmra.mxu0 %vm678_vm8, %v658_v22 }
  0xa4   : > { %755 = vmatprep.mubr.f32.mxu0 %v1940_v2 }
  0xa7   : > { %1854 = vmatmul.mubr.msk.f32.gmra.mxu0 %vm678_vm8, %v659_v23 }
  0xa8   : > { %843 = vmatprep.mubr.f32.mxu0 %v1940_v2 }
 0x109   : > { %v973_v53 = vpop.permute.xlu1 %972 }
 0x163   : > { %v2168_v26 = vpop.f32.mrf.mxu0 }
 0x164   : > { %v768_v35 = vmul.f32 %v2168_v26, %v2168_v26 }
 0x165   : > { %v2170_v27 = vpop.f32.mrf.mxu0 }
 0x166   : > { %v769_v34 = vmul.f32 %v2170_v27, %v2170_v27 }
 0x167   : > { %v2172_v28 = vpop.f32.mrf.mxu0 }
 0x168   : > { %v770_v33 = vmul.f32 %v2172_v28, %v2172_v28 }
 0x169   : > { %v2174_v29 = vpop.f32.mrf.mxu0 }
 0x16a   : > { %807 = vmatprep.subr.mxu0 %v2174_v29  ;;  %1879 = vmatprep.subr.mxu1 %v2174_v29  ;;  %v771_v32 = vmul.f32 %v2174_v29, %v2174_v29 }
 0x16b   : > { %808 = vmatpush1.msra.mxu0 %v2172_v28  ;;  %1881 = vmatpush1.msra.mxu1 %v2172_v28 }
 0x16c   : > { %809 = vmatprep.subr.mxu0 %v2170_v27  ;;  %1880 = vmatprep.subr.mxu1 %v2170_v27 }
 0x16d   : > { %810 = vmatpush1.msra.mxu0 %v2168_v26  ;;  %1882 = vmatpush1.msra.mxu1 %v2168_v26 }
 0x16e   : > { %1855 = vmatmul.mubr.msk.f32.vlgmr.msra.gmra.mxu0 %vm772_vm9, %v762_v30  ;;  %1856 = vmatmul.mubr.msk.f32.vlgmr.msra.gmra.mxu1 %vm772_vm9, %v763_v31 }
 0x16f   : > { %884 = vmatprep.subr.mxu1 %v771_v32  ;;  %920 = vmatprep.mubr.f32.mxu1 %v1940_v2 }
 0x170   : > { %885 = vmatpush1.msra.mxu1 %v770_v33  ;;  %1492 = vmatprep.mubr.f32.mxu0 %v1940_v2 }
 0x171   : > { %886 = vmatprep.subr.mxu1 %v769_v34 }
 0x172   : > { %887 = vmatpush1.msra.mxu1 %v768_v35 }
 0x173   : > { %1857 = vmatmul.mubr.msk.f32.vlgmr.msra.gmra.mxu1 %vm772_vm9, %v762_v30 }
 0x174   : > { %926 = vmatprep.mubr.f32.mxu1 %v1940_v2 }
 0x177   : > { %1858 = vmatmul.mubr.msk.f32.gmra.mxu1 %vm772_vm9, %v763_v31 }
 0x22e   : > { %v845_v36 = vpop.f32.mrf.mxu0  ;;  %v851_v37 = vpop.f32.mrf.mxu1 }
 0x230   : > { %v847_v38 = vpop.f32.mrf.mxu0  ;;  %v853_v39 = vpop.f32.mrf.mxu1 }
 0x231   : > { %v933_v40 = vadd.f32 %v847_v38, %v845_v36  ;;  %v936_v41 = vadd.f32 %v853_v39, %v851_v37 }
 0x233   : > { %v922_v42 = vpop.f32.mrf.mxu1  ;;  %937 = vadd.xlane.f32.xlu0 %v936_v41  ;;  %934 = vadd.xlane.f32.xlu1 %v933_v40 }
 0x235   : > { %v924_v43 = vpop.f32.mrf.mxu1 }
 0x236   : > { %v941_v44 = vadd.f32 %v924_v43, %v922_v42 }
 0x237   : > { %v928_v45 = vpop.f32.mrf.mxu1 }
 0x238   : > { %942 = vadd.xlane.f32.xlu0 %v941_v44 }
 0x239   : > { %v930_v46 = vpop.f32.mrf.mxu1 }
 0x23a   : > { %v944_v47 = vadd.f32 %v930_v46, %v928_v45 }
 0x23c   : > { %945 = vadd.xlane.f32.xlu0 %v944_v47 }
 0x244   : > { %986 = vperm.xlu1 %1901, %v767_v48  }
 0x248   : > { %981 = vperm.xlu1 %1901, %v766_v49  }
 0x24c   : > { %1022 = vperm.xlu1 %1901, %v1014_v50  }
 0x250   : > { %1017 = vperm.xlu1 %1901, %v1013_v51  }
 0x252   : > { %967 = vperm.xlu0 %1902, %v764_v52  }
 0x2bc   : > { %v938_v54 = vpop.xlane.xlu0 %937  ;;  %v935_v55 = vpop.xlane.xlu1 %934 }
 0x2bd   : > { %v939_v56 = vmul.f32 0.001953125, %v935_v55  ;;  %v940_v58 = vmul.f32 0.001953125, %v938_v54 }
 0x2bf   : > { %v949_v59 = vmul.f32 %v939_v56, %v939_v56  ;;  %v950_v3 = vmul.f32 %v940_v58, %v940_v58  ;;  %v953_v11 = vsub.f32 %v2168_v26, %v939_v56  ;;  %v954_v12 = vsub.f32 %v2170_v27, %v939_v56 }
 0x2c0   : > { %v987_v10 = vpop.permute.xlu1 %986  ;;  %v955_v23 = vsub.f32 %v2172_v28, %v940_v58  ;;  %v956_v27 = vsub.f32 %v2174_v29, %v940_v58  ;;  %v1414_v58 = vld [vmem:[%s2527_s6] sm:$0xff] }
 0x2c1   : > { %v943_v57 = vpop.xlane.xlu0 %942 }
 0x2c2   : > { %v947_v60 = vmul.f32 0.001953125, %v943_v57  ;;  %v1290_v57 = vld [vmem:[%s2524_s3 + $0x8] sm:$0xff] }
 0x2c3   : > { %1866 = vmatprep.mubr.msk.f32.mxu1 %vm772_vm9, %v1290_v57 }
 0x2c4   : > { %v951_v61 = vsub.f32 %v947_v60, %v949_v59  ;;  %v982_v19 = vpop.permute.xlu1 %981 }
 0x2c5   : > { %v946_v62 = vpop.xlane.xlu0 %945 }
 0x2c6   : > { %v957_v63 = vadd.f32 1e-05, %v951_v61  ;;  %v948_v4 = vmul.f32 0.001953125, %v946_v62 }
 0x2c8   : > { %1903 = vrsqrt.f32 %v957_v63  ;;  %v952_v8 = vsub.f32 %v948_v4, %v950_v3  ;;  %v1023_v34 = vpop.permute.xlu1 %1022 }
 0x2ca   : > { %v958_v9 = vadd.f32 1e-05, %v952_v8 }
 0x2cc   : > { %1905 = vrsqrt.f32 %v958_v9  ;;  %v1018_v42 = vpop.permute.xlu1 %1017 }
 0x2cd   : > { %v968_v14 = vpop.permute.xlu0 %967 }
 0x2d5   : > { %v1904_v13 = vpop.eup %1903 }
 0x2d6   : > { %v961_v15 = vmul.f32 %v1904_v13, %v953_v11  ;;  %v962_v16 = vmul.f32 %v1904_v13, %v954_v12 }
 0x2d8   : > { %v975_v17 = vmul.f32 %v968_v14, %v961_v15  ;;  %v976_v18 = vmul.f32 %v968_v14, %v962_v16  ;;  %v1864_v16 = vld [vmem:[%s2533_s12 + $0x7] ss:$8 sm:$0x3] }
 0x2d9   : > { %v1906_v20 = vpop.eup %1905 }
 0x2da   : > { %v989_v21 = vadd.f32 %v982_v19, %v975_v17  ;;  %v990_v22 = vadd.f32 %v982_v19, %v976_v18  ;;  %v963_v24 = vmul.f32 %v1906_v20, %v955_v23  ;;  %v964_v32 = vmul.f32 %v1906_v20, %v956_v27 }
 0x2db   : > { %v1242_v17 = vrot.slane %v1864_v16, %v2071_v6  ;;  %v1246_v18 = vrot.slane %v1864_v16, %v2073_v7 }
 0x2dc   : > { %v997_v25 = vmul.f32 0.70710677, %v989_v21  ;;  %v998_v30 = vmul.f32 0.70710677, %v990_v22  ;;  %v977_v31 = vmul.f32 %v973_v53, %v963_v24  ;;  %v978_v36 = vmul.f32 %v973_v53, %v964_v32 }
 0x2dd   : > { %v993_v37 = vmul.f32 0.5, %v989_v21  ;;  %v994_v40 = vmul.f32 0.5, %v990_v22  ;;  %v1863_v22 = vld [vmem:[%s2533_s12 + $0x6] ss:$8 sm:$0x3] }
 0x2de   : > { %1907 = verf.f32 %v997_v25  ;;  %v991_v26 = vadd.f32 %v987_v10, %v977_v31  ;;  %v992_v43 = vadd.f32 %v987_v10, %v978_v36  ;;  %v1210_v27 = vrot.slane %v1863_v22, %v2071_v6  ;;  %v1862_v36 = vld [vmem:[%s2533_s12 + $0x5] ss:$8 sm:$0x3] }
 0x2df   : > { %1909 = verf.f32 %v998_v30  ;;  %v1214_v32 = vrot.slane %v1863_v22, %v2073_v7 }
 0x2e0   : > { %v999_v33 = vmul.f32 0.70710677, %v991_v26  ;;  %v1000_v29 = vmul.f32 0.70710677, %v992_v43  ;;  %v995_v49 = vmul.f32 0.5, %v991_v26  ;;  %v996_v54 = vmul.f32 0.5, %v992_v43 }
 0x2e1   : > { %v1178_v43 = vrot.slane %v1862_v36, %v2071_v6 }
 0x2e2   : > { %1911 = verf.f32 %v999_v33 }
 0x2e3   : > { %1913 = verf.f32 %v1000_v29 }
 0x2eb   : > { %v1908_v35 = vpop.eup %1907 }
 0x2ec   : > { %v1005_v38 = vadd.f32 1.0, %v1908_v35  ;;  %v1910_v39 = vpop.eup %1909 }
 0x2ed   : > { %v1006_v28 = vadd.f32 1.0, %v1910_v39 }
 0x2ee   : > { %v1009_v41 = vmul.f32 %v1005_v38, %v993_v37 }
 0x2ef   : > { %v1010_v44 = vmul.f32 %v1006_v28, %v994_v40  ;;  %v1912_v47 = vpop.eup %1911 }
 0x2f0   : > { %v2223_v45 = vadd.f32 %v1018_v42, %v1009_v41  ;;  %v1007_v48 = vadd.f32 1.0, %v1912_v47  ;;  %v1914_v52 = vpop.eup %1913 }
 0x2f1   : > { %v2229_v46 = vadd.f32 %v1018_v42, %v1010_v44  ;;  %v1008_v53 = vadd.f32 1.0, %v1914_v52  ;;  %v1182_v44 = vrot.slane %v1862_v36, %v2073_v7 }
 0x2f2   : > { %1193 = vrot.lane.b32.xlu0 %v2223_v45, %s1937_s16  ;;  %1225 = vrot.lane.b32.xlu1 %v2223_v45, %s1935_s14  ;;  %v1011_v50 = vmul.f32 %v1007_v48, %v995_v49 }
 0x2f3   : > { %v1012_v55 = vmul.f32 %v1008_v53, %v996_v54 }
 0x2f4   : > { %v2247_v51 = vadd.f32 %v1023_v34, %v1011_v50 }
 0x2f5   : > { %v2261_v56 = vadd.f32 %v1023_v34, %v1012_v55 }
 0x2f6   : > { %1161 = vrot.lane.b32.xlu0 %v2223_v45, %s1938_s17  ;;  %1229 = vrot.lane.b32.xlu1 %v2229_v46, %s1935_s14 }
 0x2fa   : > { %1125 = vrot.lane.b32.xlu0 %v2223_v45, %s1939_s18  ;;  %1197 = vrot.lane.b32.xlu1 %v2229_v46, %s1937_s16 }
 0x2fe   : > { %1093 = vrot.lane.b32.xlu0 %v2223_v45, %s1941_s19  ;;  %1165 = vrot.lane.b32.xlu1 %v2229_v46, %s1938_s17 }
 0x302   : > { %1061 = vrot.lane.b32.xlu0 %v2223_v45, %s2541_s27  ;;  %1129 = vrot.lane.b32.xlu1 %v2229_v46, %s1939_s18 }
 0x306   : > { %1195 = vrot.lane.b32.xlu0 %v2247_v51, %s1937_s16  ;;  %1097 = vrot.lane.b32.xlu1 %v2229_v46, %s1941_s19 }
 0x30a   : > { %1163 = vrot.lane.b32.xlu0 %v2247_v51, %s1938_s17  ;;  %1065 = vrot.lane.b32.xlu1 %v2229_v46, %s2541_s27 }
 0x30e   : > { %1029 = vrot.lane.b32.xlu0 %v2223_v45, %s2542_s15  ;;  %1227 = vrot.lane.b32.xlu1 %v2247_v51, %s1935_s14 }
 0x312   : > { %1127 = vrot.lane.b32.xlu0 %v2247_v51, %s1939_s18  ;;  %1231 = vrot.lane.b32.xlu1 %v2261_v56, %s1935_s14 }
 0x316   : > { %1095 = vrot.lane.b32.xlu0 %v2247_v51, %s1941_s19  ;;  %1199 = vrot.lane.b32.xlu1 %v2261_v56, %s1937_s16 }
 0x31a   : > { %1063 = vrot.lane.b32.xlu0 %v2247_v51, %s2541_s27  ;;  %1167 = vrot.lane.b32.xlu1 %v2261_v56, %s1938_s17 }
 0x31e   : > { %1031 = vrot.lane.b32.xlu0 %v2247_v51, %s2542_s15  ;;  %1033 = vrot.lane.b32.xlu1 %v2229_v46, %s2542_s15 }
 0x322   : > { %1259 = vrot.lane.b32.xlu0 %v2247_v51, %s2543_s20  ;;  %1131 = vrot.lane.b32.xlu1 %v2261_v56, %s1939_s18 }
 0x326   : > { %1257 = vrot.lane.b32.xlu0 %v2223_v45, %s2543_s20  ;;  %1099 = vrot.lane.b32.xlu1 %v2261_v56, %s1941_s19 }
 0x32a   : > { %1067 = vrot.lane.b32.xlu1 %v2261_v56, %s2541_s27 }
 0x32e   : > { %1035 = vrot.lane.b32.xlu1 %v2261_v56, %s2542_s15 }
 0x332   : > { %1263 = vrot.lane.b32.xlu1 %v2261_v56, %s2543_s20 }
 0x336   : > { %1261 = vrot.lane.b32.xlu1 %v2229_v46, %s2543_s20  ;;  %s1878_s20 = sshll.u32 %s2545_s26, 5 }
 0x337   : > { %s460_s17 = scalar_lea.vmem %s2534_s13, %s1878_s20 }
 0x33a   : > { %1616 = vperm.xlu1 %1901, %v1414_v58  }
 0x364   : > { %v1194_v59 = vpop.permute.xlu0 %1193  ;;  %v1226_v60 = vpop.permute.xlu1 %1225 }
 0x368   : > { %v1162_v61 = vpop.permute.xlu0 %1161  ;;  %v1230_v62 = vpop.permute.xlu1 %1229 }
 0x369   : > { %v1235_v21 = vsel %vm614_vm0, %v1230_v62, %v1226_v60  ;;  %v1233_v25 = vsel %vm614_vm0, %v1226_v60, %v1230_v62  ;;  %v1861_v60 = vld [vmem:[%s2533_s12 + $0x3] ss:$8 sm:$0x3] }
 0x36a   : > { %v1250_v26 = vmul.f32 %v1246_v18, %v1235_v21  ;;  %v1249_v34 = vmul.f32 %v1242_v17, %v1233_v25  ;;  %v1142_v62 = vrot.slane %v1861_v60, %v2071_v6 }
 0x36c   : > { %v2302_v63 = vpop.permute.xlu0 %1125  ;;  %v1198_v3 = vpop.permute.xlu1 %1197 }
 0x36d   : > { %v1203_v35 = vsel %vm590_vm2, %v1198_v3, %v1194_v59  ;;  %v1201_v39 = vsel %vm590_vm2, %v1194_v59, %v1198_v3 }
 0x36e   : > { %v1218_v42 = vmul.f32 %v1214_v32, %v1203_v35  ;;  %v1217_v47 = vmul.f32 %v1210_v27, %v1201_v39 }
 0x370   : > { %v2304_v4 = vpop.permute.xlu0 %1093  ;;  %v1166_v8 = vpop.permute.xlu1 %1165 }
 0x371   : > { %v1171_v48 = vsel %vm566_vm3, %v1166_v8, %v1162_v61  ;;  %v1169_v52 = vsel %vm566_vm3, %v1162_v61, %v1166_v8  ;;  %v1146_v61 = vrot.slane %v1861_v60, %v2073_v7 }
 0x372   : > { %v1186_v55 = vmul.f32 %v1182_v44, %v1171_v48  ;;  %v1185_v59 = vmul.f32 %v1178_v43, %v1169_v52 }
 0x374   : > { %v2306_v9 = vpop.permute.xlu0 %1061  ;;  %v2308_v10 = vpop.permute.xlu1 %1129 }
 0x375   : > { %v1133_v8 = vsel %vm540_vm4, %v2302_v63, %v2308_v10 }
 0x378   : > { %v1196_v11 = vpop.permute.xlu0 %1195  ;;  %v2310_v12 = vpop.permute.xlu1 %1097 }
 0x37c   : > { %v2312_v13 = vpop.permute.xlu1 %1065  ;;  %v1164_v14 = vpop.permute.xlu0 %1163 }
 0x37d   : > { %v1069_v35 = vsel %vm492_vm6, %v2306_v9, %v2312_v13 }
 0x380   : > { %v1228_v15 = vpop.permute.xlu1 %1227  ;;  %v2319_v19 = vpop.permute.xlu0 %1029 }
 0x384   : > { %v1232_v20 = vpop.permute.xlu1 %1231  ;;  %v1128_v40 = vpop.permute.xlu0 %1127 }
 0x385   : > { %v1234_v23 = vsel %vm614_vm0, %v1228_v15, %v1232_v20  ;;  %v1236_v24 = vsel %vm614_vm0, %v1232_v20, %v1228_v15  ;;  %v1150_v20 = vmul.f32 %v1146_v61, %v1133_v8 }
 0x386   : > { %v1251_v30 = vmul.f32 %v1242_v17, %v1234_v23  ;;  %v1252_v31 = vmul.f32 %v1246_v18, %v1236_v24  ;;  %v1103_v24 = vsel %vm516_vm5, %v2310_v12, %v2304_v4 }
 0x388   : > { %1335 = vmatprep.subr.mxu1 %v1252_v31  ;;  %v1200_v33 = vpop.permute.xlu1 %1199  ;;  %v1096_v57 = vpop.permute.xlu0 %1095 }
 0x389   : > { %v1202_v37 = vsel %vm590_vm2, %v1196_v11, %v1200_v33  ;;  %v1204_v38 = vsel %vm590_vm2, %v1200_v33, %v1196_v11  ;;  %1336 = vmatpush1.msra.mxu1 %v1251_v30  ;;  %v1860_v11 = vld [vmem:[%s2533_s12 + $0x2] ss:$8 sm:$0x3] }
 0x38a   : > { %v1219_v28 = vmul.f32 %v1210_v27, %v1202_v37  ;;  %v1220_v41 = vmul.f32 %v1214_v32, %v1204_v38  ;;  %1337 = vmatprep.subr.mxu1 %v1250_v26  ;;  %v1110_v21 = vrot.slane %v1860_v11, %v2071_v6  ;;  %v1114_v22 = vrot.slane %v1860_v11, %v2073_v7  ;;  %v1865_v37 = vld [vmem:[%s2533_s12 + $0x10] ss:$8 sm:$0x3]  ;;  %v1289_v11 = vld [vmem:[%s2524_s3] sm:$0xff] }
 0x38b   : > { %1338 = vmatpush1.msra.mxu1 %v1249_v34  ;;  %v1071_v38 = vsel %vm492_vm6, %v2312_v13, %v2306_v9  ;;  %v1278_v52 = vrot.slane %v1865_v37, %v2073_v7 }
 0x38c   : > { %1339 = vmatprep.subr.mxu1 %v1220_v41  ;;  %v1168_v29 = vpop.permute.xlu1 %1167  ;;  %v1064_v16 = vpop.permute.xlu0 %1063  ;;  %v1117_v34 = vmul.f32 %v1110_v21, %v1103_v24 }
 0x38d   : > { %v1170_v49 = vsel %vm566_vm3, %v1164_v14, %v1168_v29  ;;  %v1172_v50 = vsel %vm566_vm3, %v1168_v29, %v1164_v14  ;;  %1340 = vmatpush1.msra.mxu1 %v1219_v28 }
 0x38e   : > { %v1187_v53 = vmul.f32 %v1178_v43, %v1170_v49  ;;  %v1188_v54 = vmul.f32 %v1182_v44, %v1172_v50  ;;  %1341 = vmatprep.subr.mxu1 %v1218_v42  ;;  %v1274_v44 = vrot.slane %v1865_v37, %v2071_v6 }
 0x38f   : > { %1342 = vmatpush1.msra.mxu1 %v1217_v47 }
 0x390   : > { %1343 = vmatprep.subr.mxu1 %v1188_v54  ;;  %v2355_v58 = vpop.permute.xlu1 %1033  ;;  %v1032_v32 = vpop.permute.xlu0 %1031 }
 0x391   : > { %1344 = vmatpush1.msra.mxu1 %v1187_v53  ;;  %v1037_v47 = vsel %vm469_vm7, %v2319_v19, %v2355_v58  ;;  %v1039_v48 = vsel %vm469_vm7, %v2355_v58, %v2319_v19 }
 0x392   : > { %1345 = vmatprep.subr.mxu1 %v1186_v55 }
 0x393   : > { %1346 = vmatpush1.msra.mxu1 %v1185_v59 }
 0x394   : > { %1347 = vmatprep.subr.mxu1 %v2261_v56  ;;  %v1132_v3 = vpop.permute.xlu1 %1131  ;;  %v1135_v56 = vsel %vm540_vm4, %v2308_v10, %v2302_v63  ;;  %v1101_v63 = vsel %vm516_vm5, %v2304_v4, %v2310_v12  ;;  %v1859_v10 = vld [vmem:[%s2533_s12 + $0x1] ss:$8 sm:$0x3]  ;;  %v1041_v4 = vld [vmem:[%s2533_s12] ss:$8 sm:$0x3]  ;;  %v1260_v49 = vpop.permute.xlu0 %1259 }
 0x395   : > { %v1134_v14 = vsel %vm540_vm4, %v1128_v40, %v1132_v3  ;;  %v1136_v15 = vsel %vm540_vm4, %v1132_v3, %v1128_v40  ;;  %1348 = vmatpush1.msra.mxu1 %v2247_v51  ;;  %v1149_v51 = vmul.f32 %v1142_v62, %v1135_v56  ;;  %v1118_v31 = vmul.f32 %v1114_v22, %v1101_v63  ;;  %v1662_v63 = vld [vmem:[%s2529_s8] sm:$0xff] }
 0x396   : > { %v1151_v17 = vmul.f32 %v1142_v62, %v1136_v15  ;;  %v1152_v18 = vmul.f32 %v1146_v61, %v1134_v14  ;;  %1349 = vmatprep.subr.mxu1 %v2229_v46  ;;  %v1078_v26 = vrot.slane %v1859_v10, %v2071_v6  ;;  %v1082_v27 = vrot.slane %v1859_v10, %v2073_v7  ;;  %v1292_v14 = vld [vmem:[%s2524_s3 + $0x18] sm:$0xff] }
 0x397   : > { %1350 = vmatpush1.msra.mxu1 %v2223_v45  ;;  %v1046_v41 = vrot.slane %v1041_v4, %v2071_v6  ;;  %v1050_v42 = vrot.slane %v1041_v4, %v2073_v7  ;;  %v1415_v4 = vld [vmem:[%s2527_s6 + $0x8] sm:$0xff] }
 0x398   : > { %1351 = vmatprep.subr.mxu1 %v1152_v18  ;;  %v1100_v23 = vpop.permute.xlu1 %1099  ;;  %v1086_v28 = vmul.f32 %v1082_v27, %v1069_v35  ;;  %v1085_v29 = vmul.f32 %v1078_v26, %v1071_v38  ;;  %v1258_v58 = vpop.permute.xlu0 %1257  ;;  %v1412_v18 = vld [vmem:[%s2532_s11] sm:$0xff]  ;;  %v1665_v35 = vld [vmem:[%s2530_s9 + $0x8] sm:$0xff] }
 0x399   : > { %v1102_v45 = vsel %vm516_vm5, %v1096_v57, %v1100_v23  ;;  %v1104_v46 = vsel %vm516_vm5, %v1100_v23, %v1096_v57  ;;  %1352 = vmatpush1.msra.mxu1 %v1151_v17  ;;  %v1054_v53 = vmul.f32 %v1050_v42, %v1037_v47  ;;  %v1053_v55 = vmul.f32 %v1046_v41, %v1039_v48 }
 0x39a   : > { %v1119_v25 = vmul.f32 %v1110_v21, %v1104_v46  ;;  %v1120_v30 = vmul.f32 %v1114_v22, %v1102_v45  ;;  %1353 = vmatprep.subr.mxu1 %v1150_v20 }
 0x39b   : > { %1354 = vmatpush1.msra.mxu1 %v1149_v51  ;;  %v1413_v51 = vld [vmem:[%s2532_s11 + $0x8] sm:$0xff] }
 0x39c   : > { %1355 = vmatprep.subr.mxu1 %v1120_v30  ;;  %v1068_v33 = vpop.permute.xlu1 %1067 }
 0x39d   : > { %v1070_v12 = vsel %vm492_vm6, %v1064_v16, %v1068_v33  ;;  %v1072_v36 = vsel %vm492_vm6, %v1068_v33, %v1064_v16  ;;  %1356 = vmatpush1.msra.mxu1 %v1119_v25  ;;  %v1416_v33 = vld [vmem:[%s2528_s7] sm:$0xff] }
 0x39e   : > { %v1087_v39 = vmul.f32 %v1078_v26, %v1072_v36  ;;  %v1088_v40 = vmul.f32 %v1082_v27, %v1070_v12  ;;  %1357 = vmatprep.subr.mxu1 %v1118_v31  ;;  %v1664_v12 = vld [vmem:[%s2530_s9] sm:$0xff] }
 0x39f   : > { %1358 = vmatpush1.msra.mxu1 %v1117_v34  ;;  %v1417_v34 = vld [vmem:[%s2528_s7 + $0x8] sm:$0xff] }
 0x3a0   : > { %1359 = vmatprep.subr.mxu1 %v1088_v40  ;;  %v1036_v43 = vpop.permute.xlu1 %1035 }
 0x3a1   : > { %v1038_v9 = vsel %vm469_vm7, %v1032_v32, %v1036_v43  ;;  %v1040_v13 = vsel %vm469_vm7, %v1036_v43, %v1032_v32  ;;  %1360 = vmatpush1.msra.mxu1 %v1087_v39 }
 0x3a2   : > { %v1055_v6 = vmul.f32 %v1046_v41, %v1040_v13  ;;  %v1056_v50 = vmul.f32 %v1050_v42, %v1038_v9  ;;  %1361 = vmatprep.subr.mxu1 %v1086_v28 }
 0x3a3   : > { %1362 = vmatpush1.msra.mxu1 %v1085_v29 }
 0x3a4   : > { %1363 = vmatprep.subr.mxu1 %v1056_v50  ;;  %v1264_v54 = vpop.permute.xlu1 %1263 }
 0x3a5   : > { %v1266_v57 = vsel %vm638_vm1, %v1260_v49, %v1264_v54  ;;  %v1268_v59 = vsel %vm638_vm1, %v1264_v54, %v1260_v49  ;;  %1364 = vmatpush1.msra.mxu1 %v1055_v6 }
 0x3a6   : > { %v1283_v60 = vmul.f32 %v1274_v44, %v1266_v57  ;;  %v1284_v19 = vmul.f32 %v1278_v52, %v1268_v59  ;;  %1365 = vmatprep.subr.mxu1 %v1054_v53 }
 0x3a7   : > { %1366 = vmatpush1.msra.mxu1 %v1053_v55 }
 0x3a8   : > { %1395 = vmatprep.subr.mxu1 %v1284_v19  ;;  %v1262_v62 = vpop.permute.xlu1 %1261 }
 0x3a9   : > { %v1265_v7 = vsel %vm638_vm1, %v1258_v58, %v1262_v62  ;;  %v1267_v61 = vsel %vm638_vm1, %v1262_v62, %v1258_v58  ;;  %1396 = vmatpush2.msra.mxu1 %v1283_v60 }
 0x3aa   : > { %v1281_v3 = vmul.f32 %v1274_v44, %v1265_v7  ;;  %v1282_v8 = vmul.f32 %v1278_v52, %v1267_v61 }
 0x3ac   : > { %1397 = vmatprep.subr.mxu1 %v1282_v8 }
 0x3ad   : > { %1398 = vmatpush2.msra.mxu1 %v1281_v3 }
 0x3ae   : > { %1400 = vmatmul.mubr.f32.vlgmr.msra.gmra.mxu1 %v1289_v11 }
 0x3af   : > { %1867 = vmatprep.mubr.msk.f32.mxu1 %vm772_vm9, %v1292_v14 }
 0x3b2   : > { %1406 = vmatmul.mubr.f32.gmra.mxu1 %v1291_v5 }
 0x3b5   : > { %v1617_v36 = vpop.permute.xlu1 %1616 }
 0x46e   : > { %v2452_v15 = vpop.f32.mrf.mxu1 }
 0x46f   : > { %v1418_v23 = vmul.f32 %v2452_v15, %v2452_v15 }
 0x470   : > { %v2454_v56 = vpop.f32.mrf.mxu1 }
 0x471   : > { %v1419_v22 = vmul.f32 %v2454_v56, %v2454_v56 }
 0x472   : > { %v2456_v16 = vpop.f32.mrf.mxu1 }
 0x473   : > { %v1420_v21 = vmul.f32 %v2456_v16, %v2456_v16 }
 0x474   : > { %v2458_v17 = vpop.f32.mrf.mxu1 }
 0x475   : > { %1456 = vmatprep.subr.mxu0 %v2458_v17  ;;  %v1421_v20 = vmul.f32 %v2458_v17, %v2458_v17 }
 0x476   : > { %1457 = vmatpush1.msra.mxu0 %v2456_v16 }
 0x477   : > { %1458 = vmatprep.subr.mxu0 %v2454_v56 }
 0x478   : > { %1459 = vmatpush1.msra.mxu0 %v2452_v15 }
 0x479   : > { %1868 = vmatmul.mubr.msk.f32.vlgmr.msra.gmra.mxu0 %vm772_vm9, %v1412_v18  ;;  %1533 = vmatprep.subr.mxu0 %v1421_v20 }
 0x47a   : > { %1534 = vmatpush1.msra.mxu0 %v1420_v21  ;;  %1498 = vmatprep.mubr.f32.mxu0 %v1940_v2 }
 0x47b   : > { %1535 = vmatprep.subr.mxu0 %v1419_v22 }
 0x47c   : > { %1536 = vmatpush1.msra.mxu0 %v1418_v23 }
 0x47d   : > { %1869 = vmatmul.mubr.msk.f32.gmra.mxu0 %vm772_vm9, %v1413_v51  ;;  %1713 = vmatprep.subr.mxu0 %v2037_v1  ;;  %v1663_v1 = vld [vmem:[%s2529_s8 + $0x8] sm:$0xff] }
 0x47e   : > { %1569 = vmatprep.mubr.f32.mxu0 %v1940_v2 }
 0x481   : > { %1870 = vmatmul.mubr.msk.f32.vlgmr.msra.gmra.mxu0 %vm772_vm9, %v1412_v18 }
 0x482   : > { %1575 = vmatprep.mubr.f32.mxu0 %v1940_v2  ;;  %1714 = vmatpush1.msra.mxu0 %v2031_v0 }
 0x485   : > { %1871 = vmatmul.mubr.msk.f32.gmra.mxu0 %vm772_vm9, %v1413_v51 }
 0x486   : > { %1747 = vmatprep.mubr.f32.mxu0 %v1940_v2 }
 0x489   : > { %1872 = vmatmul.mubr.msk.f32.vlgmr.msra.gmra.mxu0 %vm1676_vm10, %v1662_v63 }
 0x48a   : > { %1753 = vmatprep.mubr.f32.mxu0 %v1940_v2 }
 0x48d   : > { %1873 = vmatmul.mubr.msk.f32.gmra.mxu0 %vm1676_vm10, %v1663_v1 }
 0x539   : > { %v1494_v10 = vpop.f32.mrf.mxu0 }
 0x53b   : > { %v1496_v45 = vpop.f32.mrf.mxu0 }
 0x53c   : > { %v1582_v0 = vadd.f32 %v1496_v45, %v1494_v10 }
 0x53d   : > { %v1500_v46 = vpop.f32.mrf.mxu0 }
 0x53e   : > { %1583 = vadd.xlane.f32.xlu0 %v1582_v0 }
 0x53f   : > { %v1502_v24 = vpop.f32.mrf.mxu0 }
 0x540   : > { %v1585_v25 = vadd.f32 %v1502_v24, %v1500_v46 }
 0x541   : > { %v1571_v30 = vpop.f32.mrf.mxu0 }
 0x542   : > { %1586 = vadd.xlane.f32.xlu1 %v1585_v25 }
 0x543   : > { %v1573_v31 = vpop.f32.mrf.mxu0 }
 0x544   : > { %v1590_v26 = vadd.f32 %v1573_v31, %v1571_v30 }
 0x545   : > { %v1577_v27 = vpop.f32.mrf.mxu0 }
 0x546   : > { %1591 = vadd.xlane.f32.xlu0 %v1590_v26 }
 0x547   : > { %v1579_v32 = vpop.f32.mrf.mxu0 }
 0x548   : > { %v1593_v2 = vadd.f32 %v1579_v32, %v1577_v27 }
 0x549   : > { %v1749_v20 = vpop.f32.mrf.mxu0 }
 0x54a   : > { %1594 = vadd.xlane.f32.xlu0 %v1593_v2 }
 0x54b   : > { %v1751_v21 = vpop.f32.mrf.mxu0 }
 0x54d   : > { %v1755_v45 = vpop.f32.mrf.mxu0 }
 0x54f   : > { %v1757_v2 = vpop.f32.mrf.mxu0 }
 0x553   : > { %1630 = vperm.xlu1 %1901, %v1416_v33  }
 0x557   : > { %1635 = vperm.xlu1 %1901, %v1417_v34  }
 0x55b   : > { %1673 = vperm.xlu1 %1901, %v1665_v35  }
 0x560   : > { %1621 = vperm.xlu0 %1902, %v1415_v4  }
 0x564   : > { %1668 = vperm.xlu0 %1902, %v1664_v12  }
 0x5c7   : > { %v1584_v37 = vpop.xlane.xlu0 %1583 }
 0x5c8   : > { %v1588_v38 = vmul.f32 0.001953125, %v1584_v37 }
 0x5ca   : > { %v1598_v41 = vmul.f32 %v1588_v38, %v1588_v38  ;;  %v1602_v49 = vsub.f32 %v2452_v15, %v1588_v38  ;;  %v1603_v6 = vsub.f32 %v2454_v56, %v1588_v38 }
 0x5cb   : > { %v1587_v39 = vpop.xlane.xlu1 %1586 }
 0x5cc   : > { %v1589_v28 = vmul.f32 0.001953125, %v1587_v39 }
 0x5ce   : > { %v1599_v9 = vmul.f32 %v1589_v28, %v1589_v28  ;;  %v1604_v54 = vsub.f32 %v2456_v16, %v1589_v28  ;;  %v1605_v55 = vsub.f32 %v2458_v17, %v1589_v28 }
 0x5cf   : > { %v1592_v40 = vpop.xlane.xlu0 %1591  ;;  %v1631_v60 = vpop.permute.xlu1 %1630 }
 0x5d0   : > { %v1596_v42 = vmul.f32 0.001953125, %v1592_v40 }
 0x5d2   : > { %v1600_v43 = vsub.f32 %v1596_v42, %v1598_v41 }
 0x5d3   : > { %v1595_v44 = vpop.xlane.xlu0 %1594  ;;  %v1636_v15 = vpop.permute.xlu1 %1635 }
 0x5d4   : > { %v1606_v29 = vadd.f32 1e-05, %v1600_v43  ;;  %v1597_v47 = vmul.f32 0.001953125, %v1595_v44 }
 0x5d6   : > { %1915 = vrsqrt.f32 %v1606_v29  ;;  %v1601_v13 = vsub.f32 %v1597_v47, %v1599_v9 }
 0x5d7   : > { %v1674_v26 = vpop.permute.xlu1 %1673 }
 0x5d8   : > { %v1607_v48 = vadd.f32 1e-05, %v1601_v13  ;;  %v1758_v38 = vadd.f32 %v1757_v2, %v1674_v26 }
 0x5da   : > { %1917 = vrsqrt.f32 %v1607_v48 }
 0x5db   : > { %v1622_v11 = vpop.permute.xlu0 %1621 }
 0x5df   : > { %v1669_v23 = vpop.permute.xlu0 %1668 }
 0x5e0   : > { %v1750_v24 = vadd.f32 %v1749_v20, %v1669_v23  ;;  %v1752_v30 = vadd.f32 %v1751_v21, %v1669_v23 }
 0x5e3   : > { %v1916_v50 = vpop.eup %1915 }
 0x5e4   : > { %v1610_v52 = vmul.f32 %v1916_v50, %v1602_v49  ;;  %v1611_v53 = vmul.f32 %v1916_v50, %v1603_v6 }
 0x5e6   : > { %v1624_v57 = vmul.f32 %v1617_v36, %v1610_v52  ;;  %v1625_v59 = vmul.f32 %v1617_v36, %v1611_v53  ;;  %v1756_v36 = vadd.f32 %v1755_v45, %v1674_v26 }
 0x5e7   : > { %v1918_v19 = vpop.eup %1917 }
 0x5e8   : > { %v1638_v58 = vadd.f32 %v1631_v60, %v1624_v57  ;;  %v1639_v62 = vadd.f32 %v1631_v60, %v1625_v59  ;;  %v1612_v7 = vmul.f32 %v1918_v19, %v1604_v54  ;;  %v1613_v61 = vmul.f32 %v1918_v19, %v1605_v55 }
 0x5ea   : > { %v1646_v3 = vmul.f32 0.70710677, %v1638_v58  ;;  %v1647_v8 = vmul.f32 0.70710677, %v1639_v62  ;;  %v1626_v14 = vmul.f32 %v1622_v11, %v1612_v7  ;;  %v1627_v5 = vmul.f32 %v1622_v11, %v1613_v61 }
 0x5eb   : > { %v1642_v63 = vmul.f32 0.5, %v1638_v58  ;;  %v1643_v10 = vmul.f32 0.5, %v1639_v62 }
 0x5ec   : > { %1919 = verf.f32 %v1646_v3  ;;  %v1640_v56 = vadd.f32 %v1636_v15, %v1626_v14  ;;  %v1641_v16 = vadd.f32 %v1636_v15, %v1627_v5 }
 0x5ed   : > { %1921 = verf.f32 %v1647_v8 }
 0x5ee   : > { %v1648_v17 = vmul.f32 0.70710677, %v1640_v56  ;;  %v1649_v18 = vmul.f32 0.70710677, %v1641_v16  ;;  %v1644_v33 = vmul.f32 0.5, %v1640_v56  ;;  %v1645_v4 = vmul.f32 0.5, %v1641_v16 }
 0x5f0   : > { %1923 = verf.f32 %v1648_v17 }
 0x5f1   : > { %1925 = verf.f32 %v1649_v18 }
 0x5f9   : > { %v1920_v22 = vpop.eup %1919 }
 0x5fa   : > { %v1922_v51 = vpop.eup %1921  ;;  %v1654_v1 = vadd.f32 1.0, %v1920_v22 }
 0x5fb   : > { %v1655_v0 = vadd.f32 1.0, %v1922_v51 }
 0x5fc   : > { %v1658_v46 = vmul.f32 %v1654_v1, %v1642_v63 }
 0x5fd   : > { %v1659_v25 = vmul.f32 %v1655_v0, %v1643_v10  ;;  %v1924_v31 = vpop.eup %1923 }
 0x5fe   : > { %v1760_v27 = vadd.f32 %v1750_v24, %v1658_v46  ;;  %v1926_v32 = vpop.eup %1925  ;;  %v1656_v34 = vadd.f32 1.0, %v1924_v31 }
 0x5ff   : > { %v1761_v35 = vadd.f32 %v1752_v30, %v1659_v25  ;;  %v1657_v12 = vadd.f32 1.0, %v1926_v32 }
 0x600   : > { %1764 = vst [vmem:[%s460_s17] sm:$0xff] %v1760_v27  ;;  %v1660_v37 = vmul.f32 %v1656_v34, %v1644_v33 }
 0x601   : > { %1765 = vst [vmem:[%s460_s17 + $0x8] sm:$0xff] %v1761_v35  ;;  %v1661_v39 = vmul.f32 %v1657_v12, %v1645_v4 }
 0x602   : > { %v1762_v40 = vadd.f32 %v1756_v36, %v1660_v37 }
 0x603   : > { %v1763_v28 = vadd.f32 %v1758_v38, %v1661_v39 }
 0x604   : > { %1766 = vst [vmem:[%s460_s17 + $0x10] sm:$0xff] %v1762_v40 }
 0x605   : > { %1767 = vst [vmem:[%s460_s17 + $0x18] sm:$0xff] %v1763_v28 }
 0x606 PF: > { %s23_s25 = sadd.s32 1, %s1933_s25  }
 0x607   : > { %p20_p4 = scmp.ge.s32.totalorder %s23_s25, 4  }
 0x609   :  { %22 = sbr.rel (!%p20_p4) target bundleno = 1 (0x1), region = 112 }

</bundles_post_ra>
